<compile_context>
chip_gen: v7x
topology: tpu7x:2x2x1
jax: 0.10.0
libtpu: 0.0.40
codegen_flags: <defaults>
</compile_context>

<pallas_src>
import math
import functools

import jax
import jax.numpy as jnp
import numpy as np
from jax.experimental import pallas as pl
from jax.experimental.pallas import tpu as pltpu

_SQRT_HALF = 0.7071067811865476


def _erf(x):
    # Abramowitz & Stegun 7.1.26 (max abs error ~1.5e-7). Uses only exp/mul/
    # add/abs/where/div so it is guaranteed to lower in Mosaic (no lax.erf).
    a1, a2, a3, a4, a5 = 0.254829592, -0.284496736, 1.421413741, -1.453152027, 1.061405429
    p = 0.3275911
    ax = jnp.abs(x)
    t = 1.0 / (1.0 + p * ax)
    poly = ((((a5 * t + a4) * t + a3) * t + a2) * t + a1) * t
    e = 1.0 - poly * jnp.exp(-ax * ax)
    return jnp.where(x < 0.0, -e, e)


def _gelu(x):
    # Exact (erf-based) GELU, matching torch.nn.GELU() default.
    return 0.5 * x * (1.0 + _erf(x * _SQRT_HALF))


def _shift_flat(a, s):
    # b[:, p] = a[:, (p + s) mod L]   (s != 0, static).  Two lane slices + one
    # lane concat; wrapped columns are zeroed afterwards by the border mask.
    l = a.shape[1]
    i = s % l
    return jnp.concatenate([a[:, i:], a[:, :i]], axis=1)


def _upward_kernel(x_ref, skip_ref, wupx_ref, wups_ref, scat_ref, wconv_ref,
                   bias_ref, mask_ref, o_ref, *, cout, w2):
    f32 = jnp.float32
    x = x_ref[0]       # (C1, L1)
    sk = skip_ref[0]   # (C2, L1)

    # --- ConvTranspose2d(kernel=2, stride=2); concat fused via split weight --
    up_pre = (jnp.dot(wupx_ref[...], x, preferred_element_type=f32) +
              jnp.dot(wups_ref[...], sk, preferred_element_type=f32))  # (4*Cout, L1)

    # Scatter the 4 stride-2 phases into the upsampled (Cout, L2) image with
    # constant 0/1 matrices; phase slices are exactly 8-sublane aligned.
    up = jnp.dot(up_pre[0:cout, :], scat_ref[0], preferred_element_type=f32)
    for ph in range(1, 4):
        up = up + jnp.dot(up_pre[ph * cout:(ph + 1) * cout, :], scat_ref[ph],
                          preferred_element_type=f32)
    up = up + bias_ref[0]                                               # (Cout, L2)

    def conv3x3_bn_gelu(act, w, b):
        # 3x3 'same' conv in channel-major flat layout: 9 shifted taps (flat
        # roll + constant border mask), one fused MXU matmul. BN is folded
        # into (w, b) on the host; Dropout is identity in eval mode.
        taps = []
        for oy in (-1, 0, 1):
            for ox in (-1, 0, 1):
                s = oy * w2 + ox
                t = (oy + 1) * 3 + (ox + 1)
                if s == 0:
                    taps.append(act)
                else:
                    taps.append(_shift_flat(act, s) * mask_ref[t])
        stacked = jnp.concatenate(taps, axis=0)                 # (9*Cout, L2)
        z = jnp.dot(w, stacked, preferred_element_type=f32) + b
        return _gelu(z)

    # model = Sequential(ConvT, ResidualBlock(is_res=True), ResidualBlock())
    h = conv3x3_bn_gelu(up, wconv_ref[0], bias_ref[1])
    h = conv3x3_bn_gelu(h, wconv_ref[1], bias_ref[2])
    r = h + up                                # is_res=True, same channels
    h = conv3x3_bn_gelu(r, wconv_ref[2], bias_ref[3])
    h = conv3x3_bn_gelu(h, wconv_ref[3], bias_ref[4])
    o_ref[0] = h.astype(o_ref.dtype)


@jax.jit
def upward_block_forward(x, skip, wup_x, wup_s, scat, wconv, biases, masks):
    N, C1, H, W = x.shape
    C2 = skip.shape[1]
    COUT = wconv.shape[1]
    H2, W2 = 2 * H, 2 * W
    L1, L2 = H * W, H2 * W2

    # Free (contiguous) reshapes only -- no wrapper transposes / HBM relayouts.
    x_f = x.reshape(N, C1, L1)
    s_f = skip.reshape(N, C2, L1)

    kernel = functools.partial(_upward_kernel, cout=COUT, w2=W2)

    out_flat = pl.pallas_call(
        kernel,
        out_shape=jax.ShapeDtypeStruct((N, COUT, L2), x.dtype),
        grid_spec=pltpu.PrefetchScalarGridSpec(
            num_scalar_prefetch=0,
            grid=(N,),
            in_specs=[
                pl.BlockSpec((1, C1, L1), lambda b: (b, 0, 0)),
                pl.BlockSpec((1, C2, L1), lambda b: (b, 0, 0)),
                pl.BlockSpec((4 * COUT, C1), lambda b: (0, 0)),
                pl.BlockSpec((4 * COUT, C2), lambda b: (0, 0)),
                pl.BlockSpec((4, L1, L2), lambda b: (0, 0, 0)),
                pl.BlockSpec((4, COUT, 9 * COUT), lambda b: (0, 0, 0)),
                pl.BlockSpec((5, COUT, 1), lambda b: (0, 0, 0)),
                pl.BlockSpec((9, 1, L2), lambda b: (0, 0, 0)),
            ],
            out_specs=pl.BlockSpec((1, COUT, L2), lambda b: (b, 0, 0)),
        ),
        compiler_params=pltpu.CompilerParams(
            dimension_semantics=("parallel",)),
    )(x_f, s_f, wup_x, wup_s, scat, wconv, biases, masks)

    return out_flat.reshape(N, COUT, H2, W2)


# ---------------- host-side parameter packing (BN folding etc.) --------------

def pack_params(raw, c1):
    wt = raw["wt"]                               # (Cin, Cout, 2, 2)
    cout = wt.shape[1]
    # rows ordered [(ki*2+kj)*Cout + co], columns ci
    wup = jnp.transpose(wt, (2, 3, 1, 0)).reshape(4 * cout, wt.shape[0])
    wup_x, wup_s = wup[:, :c1], wup[:, c1:]      # fuse torch.cat by splitting

    wconvs, bconvs = [], []
    for i in range(4):
        gamma, beta, mean, var = raw["bn"][i]
        scale = gamma / jnp.sqrt(var + 1e-5)                  # BN eval folding
        wf = raw["w"][i] * scale[:, None, None, None]
        bf = raw["b"][i] * scale + (beta - mean * scale)
        # [co, (ky*3+kx)*Cin + ci]  -- matches the kernel's tap stacking order
        wconvs.append(jnp.transpose(wf, (0, 2, 3, 1)).reshape(cout, 9 * cout))
        bconvs.append(bf)
    wconv = jnp.stack(wconvs, axis=0)                         # (4, Cout, 9*Cout)
    biases = jnp.stack([raw["bt"]] + bconvs, axis=0)[:, :, None]  # (5, Cout, 1)
    return wup_x, wup_s, wconv, biases


def build_scatter_and_masks(H, W):
    H2, W2 = 2 * H, 2 * W
    L1, L2 = H * W, H2 * W2
    scat = np.zeros((4, L1, L2), np.float32)
    for ki in range(2):
        for kj in range(2):
            ph = ki * 2 + kj
            for i in range(H):
                for j in range(W):
                    scat[ph, i * W + j, (2 * i + ki) * W2 + (2 * j + kj)] = 1.0
    masks = np.zeros((9, 1, L2), np.float32)
    for oy in (-1, 0, 1):
        for ox in (-1, 0, 1):
            t = (oy + 1) * 3 + (ox + 1)
            for y in range(H2):
                for xx in range(W2):
                    if 0 <= y + oy < H2 and 0 <= xx + ox < W2:
                        masks[t, 0, y * W2 + xx] = 1.0
    return jnp.asarray(scat), jnp.asarray(masks)


# ------------------------- pure-JAX reference (eval mode) --------------------

def _conv3x3_ref(x, w, b):
    y = jax.lax.conv_general_dilated(
        x, w, window_strides=(1, 1), padding=((1, 1), (1, 1)),
        dimension_numbers=("NCHW", "OIHW", "NCHW"))
    return y + b[None, :, None, None]


def _bn_eval_ref(x, gamma, beta, mean, var, eps=1e-5):
    inv = 1.0 / jnp.sqrt(var + eps)
    return ((x - mean[None, :, None, None]) * (gamma * inv)[None, :, None, None]
            + beta[None, :, None, None])


def _res_block_ref(x, w1, b1, bn1, w2, b2, bn2, is_res):
    h = jax.nn.gelu(_bn_eval_ref(_conv3x3_ref(x, w1, b1), *bn1), approximate=False)
    h = jax.nn.gelu(_bn_eval_ref(_conv3x3_ref(h, w2, b2), *bn2), approximate=False)
    return h + x if is_res else h


def upward_block_reference(x, skip, raw):
    xin = jnp.concatenate([x, skip], axis=1)
    wt, bt = raw["wt"], raw["bt"]
    N, _, H, W = xin.shape
    cout = wt.shape[1]
    t6 = jnp.einsum("ncij,cokl->noikjl", xin, wt)       # (N,Cout,H,2,W,2)
    up = t6.reshape(N, cout, 2 * H, 2 * W) + bt[None, :, None, None]
    h = _res_block_ref(up, raw["w"][0], raw["b"][0], raw["bn"][0],
                       raw["w"][1], raw["b"][1], raw["bn"][1], is_res=True)
    out = _res_block_ref(h, raw["w"][2], raw["b"][2], raw["bn"][2],
                         raw["w"][3], raw["b"][3], raw["bn"][3], is_res=False)
    return out


def init_params(key, cin, cout):
    keys = jax.random.split(key, 32)
    k = iter(keys)
    wt = jax.random.normal(next(k), (cin, cout, 2, 2), jnp.float32) / math.sqrt(cin * 4)
    bt = 0.05 * jax.random.normal(next(k), (cout,), jnp.float32)
    ws, bs, bns = [], [], []
    for _ in range(4):
        ws.append(jax.random.normal(next(k), (cout, cout, 3, 3), jnp.float32)
                  / math.sqrt(cout * 9))
        bs.append(0.05 * jax.random.normal(next(k), (cout,), jnp.float32))
        gamma = 1.0 + 0.2 * jax.random.normal(next(k), (cout,), jnp.float32)
        beta = 0.1 * jax.random.normal(next(k), (cout,), jnp.float32)
        mean = 0.1 * jax.random.normal(next(k), (cout,), jnp.float32)
        var = 0.5 + jax.random.uniform(next(k), (cout,), jnp.float32)
        bns.append((gamma, beta, mean, var))
    return dict(wt=wt, bt=bt, w=ws, b=bs, bn=bns)


if __name__ == "__main__":
    key = jax.random.PRNGKey(0)
    kx, ks, kp = jax.random.split(key, 3)

    N, C1, C2, COUT, H, W = 2, 4, 4, 8, 8, 8   # in_channels = C1 + C2 = 8
    CIN = C1 + C2

    x = jax.random.normal(kx, (N, C1, H, W), jnp.float32)
    skip = jax.random.normal(ks, (N, C2, H, W), jnp.float32)
    raw = init_params(kp, CIN, COUT)

    wup_x, wup_s, wconv, biases = pack_params(raw, C1)
    scat, masks = build_scatter_and_masks(H, W)

    out = upward_block_forward(x, skip, wup_x, wup_s, scat, wconv, biases, masks)
    out = jax.block_until_ready(out)
    assert out.shape == (N, COUT, 2 * H, 2 * W)

    ref = upward_block_reference(x, skip, raw)
    np.testing.assert_allclose(np.asarray(out), np.asarray(ref),
                               rtol=5e-4, atol=5e-4)

    print("KERNEL_OK")
</pallas_src>

<mosaic_0001>
module attributes {stable_mosaic.version = 11 : i64} {
  func.func @_upward_kernel(%arg0: i32, %arg1: memref<1x4x64xf32, #tpu.memory_space<vmem>>, %arg2: memref<1x4x64xf32, #tpu.memory_space<vmem>>, %arg3: memref<32x4xf32, #tpu.memory_space<vmem>>, %arg4: memref<32x4xf32, #tpu.memory_space<vmem>>, %arg5: memref<4x64x256xf32, #tpu.memory_space<vmem>>, %arg6: memref<4x8x72xf32, #tpu.memory_space<vmem>>, %arg7: memref<5x8x1xf32, #tpu.memory_space<vmem>>, %arg8: memref<9x1x256xf32, #tpu.memory_space<vmem>>, %arg9: memref<1x8x256xf32, #tpu.memory_space<vmem>>) attributes {dimension_semantics = [#tpu.dimension_semantics<parallel>], iteration_bounds = array<i64: 2>, scalar_prefetch = 0 : i64, scratch_operands = 0 : i64, tpu.core_type = #tpu.core_type<tc>, window_params = [{transform_indices = @transform_0, window_bounds = array<i64: 1, 4, 64>}, {transform_indices = @transform_1, window_bounds = array<i64: 1, 4, 64>}, {pipeline_mode = #tpu.pipeline_mode<synchronous>, transform_indices = @transform_2, window_bounds = array<i64: 32, 4>}, {pipeline_mode = #tpu.pipeline_mode<synchronous>, transform_indices = @transform_3, window_bounds = array<i64: 32, 4>}, {pipeline_mode = #tpu.pipeline_mode<synchronous>, transform_indices = @transform_4, window_bounds = array<i64: 4, 64, 256>}, {pipeline_mode = #tpu.pipeline_mode<synchronous>, transform_indices = @transform_5, window_bounds = array<i64: 4, 8, 72>}, {pipeline_mode = #tpu.pipeline_mode<synchronous>, transform_indices = @transform_6, window_bounds = array<i64: 5, 8, 1>}, {pipeline_mode = #tpu.pipeline_mode<synchronous>, transform_indices = @transform_7, window_bounds = array<i64: 9, 1, 256>}, {transform_indices = @transform_8, window_bounds = array<i64: 1, 8, 256>}]} {
    %c0 = arith.constant 0 : index
    %c0_0 = arith.constant 0 : index
    %c0_1 = arith.constant 0 : index
    %0 = vector.load %arg1[%c0, %c0_0, %c0_1] : memref<1x4x64xf32, #tpu.memory_space<vmem>>, vector<1x4x64xf32>
    %1 = vector.shape_cast %0 : vector<1x4x64xf32> to vector<4x64xf32>
    %c0_2 = arith.constant 0 : index
    %c0_3 = arith.constant 0 : index
    %c0_4 = arith.constant 0 : index
    %2 = vector.load %arg2[%c0_2, %c0_3, %c0_4] : memref<1x4x64xf32, #tpu.memory_space<vmem>>, vector<1x4x64xf32>
    %3 = vector.shape_cast %2 : vector<1x4x64xf32> to vector<4x64xf32>
    %c0_5 = arith.constant 0 : index
    %c0_6 = arith.constant 0 : index
    %4 = vector.load %arg3[%c0_5, %c0_6] : memref<32x4xf32, #tpu.memory_space<vmem>>, vector<32x4xf32>
    %cst = arith.constant dense<0.000000e+00> : vector<32x64xf32>
    %5 = tpu.matmul %4, %1, %cst {dimension_numbers = #tpu.dot_dimension_numbers<[1], [0], [0], [1], [0, 0, 1, 1], [], []>} : vector<32x4xf32>, vector<4x64xf32>, vector<32x64xf32> -> vector<32x64xf32>
    %c0_7 = arith.constant 0 : index
    %c0_8 = arith.constant 0 : index
    %6 = vector.load %arg4[%c0_7, %c0_8] : memref<32x4xf32, #tpu.memory_space<vmem>>, vector<32x4xf32>
    %cst_9 = arith.constant dense<0.000000e+00> : vector<32x64xf32>
    %7 = tpu.matmul %6, %3, %cst_9 {dimension_numbers = #tpu.dot_dimension_numbers<[1], [0], [0], [1], [0, 0, 1, 1], [], []>} : vector<32x4xf32>, vector<4x64xf32>, vector<32x64xf32> -> vector<32x64xf32>
    %8 = arith.addf %5, %7 : vector<32x64xf32>
    %9 = vector.extract_strided_slice %8 {offsets = [0, 0], sizes = [8, 64], strides = [1, 1]} : vector<32x64xf32> to vector<8x64xf32>
    %c0_10 = arith.constant 0 : index
    %c0_11 = arith.constant 0 : index
    %c0_12 = arith.constant 0 : index
    %10 = vector.load %arg5[%c0_10, %c0_11, %c0_12] : memref<4x64x256xf32, #tpu.memory_space<vmem>>, vector<1x64x256xf32>
    %11 = vector.shape_cast %10 : vector<1x64x256xf32> to vector<64x256xf32>
    %cst_13 = arith.constant dense<0.000000e+00> : vector<8x256xf32>
    %12 = tpu.matmul %9, %11, %cst_13 {dimension_numbers = #tpu.dot_dimension_numbers<[1], [0], [0], [1], [0, 0, 1, 1], [], []>} : vector<8x64xf32>, vector<64x256xf32>, vector<8x256xf32> -> vector<8x256xf32>
    %13 = vector.extract_strided_slice %8 {offsets = [8, 0], sizes = [8, 64], strides = [1, 1]} : vector<32x64xf32> to vector<8x64xf32>
    %c1 = arith.constant 1 : index
    %c0_14 = arith.constant 0 : index
    %c0_15 = arith.constant 0 : index
    %14 = vector.load %arg5[%c1, %c0_14, %c0_15] : memref<4x64x256xf32, #tpu.memory_space<vmem>>, vector<1x64x256xf32>
    %15 = vector.shape_cast %14 : vector<1x64x256xf32> to vector<64x256xf32>
    %cst_16 = arith.constant dense<0.000000e+00> : vector<8x256xf32>
    %16 = tpu.matmul %13, %15, %cst_16 {dimension_numbers = #tpu.dot_dimension_numbers<[1], [0], [0], [1], [0, 0, 1, 1], [], []>} : vector<8x64xf32>, vector<64x256xf32>, vector<8x256xf32> -> vector<8x256xf32>
    %17 = arith.addf %12, %16 : vector<8x256xf32>
    %18 = vector.extract_strided_slice %8 {offsets = [16, 0], sizes = [8, 64], strides = [1, 1]} : vector<32x64xf32> to vector<8x64xf32>
    %c2 = arith.constant 2 : index
    %c0_17 = arith.constant 0 : index
    %c0_18 = arith.constant 0 : index
    %19 = vector.load %arg5[%c2, %c0_17, %c0_18] : memref<4x64x256xf32, #tpu.memory_space<vmem>>, vector<1x64x256xf32>
    %20 = vector.shape_cast %19 : vector<1x64x256xf32> to vector<64x256xf32>
    %cst_19 = arith.constant dense<0.000000e+00> : vector<8x256xf32>
    %21 = tpu.matmul %18, %20, %cst_19 {dimension_numbers = #tpu.dot_dimension_numbers<[1], [0], [0], [1], [0, 0, 1, 1], [], []>} : vector<8x64xf32>, vector<64x256xf32>, vector<8x256xf32> -> vector<8x256xf32>
    %22 = arith.addf %17, %21 : vector<8x256xf32>
    %23 = vector.extract_strided_slice %8 {offsets = [24, 0], sizes = [8, 64], strides = [1, 1]} : vector<32x64xf32> to vector<8x64xf32>
    %c3 = arith.constant 3 : index
    %c0_20 = arith.constant 0 : index
    %c0_21 = arith.constant 0 : index
    %24 = vector.load %arg5[%c3, %c0_20, %c0_21] : memref<4x64x256xf32, #tpu.memory_space<vmem>>, vector<1x64x256xf32>
    %25 = vector.shape_cast %24 : vector<1x64x256xf32> to vector<64x256xf32>
    %cst_22 = arith.constant dense<0.000000e+00> : vector<8x256xf32>
    %26 = tpu.matmul %23, %25, %cst_22 {dimension_numbers = #tpu.dot_dimension_numbers<[1], [0], [0], [1], [0, 0, 1, 1], [], []>} : vector<8x64xf32>, vector<64x256xf32>, vector<8x256xf32> -> vector<8x256xf32>
    %27 = arith.addf %22, %26 : vector<8x256xf32>
    %c0_23 = arith.constant 0 : index
    %c0_24 = arith.constant 0 : index
    %c0_25 = arith.constant 0 : index
    %28 = vector.load %arg7[%c0_23, %c0_24, %c0_25] : memref<5x8x1xf32, #tpu.memory_space<vmem>>, vector<1x8x1xf32>
    %29 = vector.shape_cast %28 : vector<1x8x1xf32> to vector<8x1xf32>
    %30 = vector.broadcast %29 : vector<8x1xf32> to vector<8x256xf32>
    %31 = arith.addf %27, %30 : vector<8x256xf32>
    %c0_26 = arith.constant 0 : index
    %c0_27 = arith.constant 0 : index
    %c0_28 = arith.constant 0 : index
    %32 = vector.load %arg6[%c0_26, %c0_27, %c0_28] : memref<4x8x72xf32, #tpu.memory_space<vmem>>, vector<1x8x72xf32>
    %33 = vector.shape_cast %32 : vector<1x8x72xf32> to vector<8x72xf32>
    %c1_29 = arith.constant 1 : index
    %c0_30 = arith.constant 0 : index
    %c0_31 = arith.constant 0 : index
    %34 = vector.load %arg7[%c1_29, %c0_30, %c0_31] : memref<5x8x1xf32, #tpu.memory_space<vmem>>, vector<1x8x1xf32>
    %35 = vector.shape_cast %34 : vector<1x8x1xf32> to vector<8x1xf32>
    %36 = vector.extract_strided_slice %31 {offsets = [0, 239], sizes = [8, 17], strides = [1, 1]} : vector<8x256xf32> to vector<8x17xf32>
    %37 = vector.extract_strided_slice %31 {offsets = [0, 0], sizes = [8, 239], strides = [1, 1]} : vector<8x256xf32> to vector<8x239xf32>
    %38 = tpu.concatenate %36, %37 in 1 : vector<8x17xf32>, vector<8x239xf32> -> vector<8x256xf32>
    %c0_32 = arith.constant 0 : index
    %c0_33 = arith.constant 0 : index
    %c0_34 = arith.constant 0 : index
    %39 = vector.load %arg8[%c0_32, %c0_33, %c0_34] : memref<9x1x256xf32, #tpu.memory_space<vmem>>, vector<1x1x256xf32>
    %40 = vector.shape_cast %39 : vector<1x1x256xf32> to vector<1x256xf32>
    %41 = vector.broadcast %40 : vector<1x256xf32> to vector<8x256xf32>
    %42 = arith.mulf %38, %41 : vector<8x256xf32>
    %43 = vector.extract_strided_slice %31 {offsets = [0, 240], sizes = [8, 16], strides = [1, 1]} : vector<8x256xf32> to vector<8x16xf32>
    %44 = vector.extract_strided_slice %31 {offsets = [0, 0], sizes = [8, 240], strides = [1, 1]} : vector<8x256xf32> to vector<8x240xf32>
    %45 = tpu.concatenate %43, %44 in 1 : vector<8x16xf32>, vector<8x240xf32> -> vector<8x256xf32>
    %c1_35 = arith.constant 1 : index
    %c0_36 = arith.constant 0 : index
    %c0_37 = arith.constant 0 : index
    %46 = vector.load %arg8[%c1_35, %c0_36, %c0_37] : memref<9x1x256xf32, #tpu.memory_space<vmem>>, vector<1x1x256xf32>
    %47 = vector.shape_cast %46 : vector<1x1x256xf32> to vector<1x256xf32>
    %48 = vector.broadcast %47 : vector<1x256xf32> to vector<8x256xf32>
    %49 = arith.mulf %45, %48 : vector<8x256xf32>
    %50 = vector.extract_strided_slice %31 {offsets = [0, 241], sizes = [8, 15], strides = [1, 1]} : vector<8x256xf32> to vector<8x15xf32>
    %51 = vector.extract_strided_slice %31 {offsets = [0, 0], sizes = [8, 241], strides = [1, 1]} : vector<8x256xf32> to vector<8x241xf32>
    %52 = tpu.concatenate %50, %51 in 1 : vector<8x15xf32>, vector<8x241xf32> -> vector<8x256xf32>
    %c2_38 = arith.constant 2 : index
    %c0_39 = arith.constant 0 : index
    %c0_40 = arith.constant 0 : index
    %53 = vector.load %arg8[%c2_38, %c0_39, %c0_40] : memref<9x1x256xf32, #tpu.memory_space<vmem>>, vector<1x1x256xf32>
    %54 = vector.shape_cast %53 : vector<1x1x256xf32> to vector<1x256xf32>
    %55 = vector.broadcast %54 : vector<1x256xf32> to vector<8x256xf32>
    %56 = arith.mulf %52, %55 : vector<8x256xf32>
    %57 = vector.extract_strided_slice %31 {offsets = [0, 255], sizes = [8, 1], strides = [1, 1]} : vector<8x256xf32> to vector<8x1xf32>
    %58 = vector.extract_strided_slice %31 {offsets = [0, 0], sizes = [8, 255], strides = [1, 1]} : vector<8x256xf32> to vector<8x255xf32>
    %59 = tpu.concatenate %57, %58 in 1 : vector<8x1xf32>, vector<8x255xf32> -> vector<8x256xf32>
    %c3_41 = arith.constant 3 : index
    %c0_42 = arith.constant 0 : index
    %c0_43 = arith.constant 0 : index
    %60 = vector.load %arg8[%c3_41, %c0_42, %c0_43] : memref<9x1x256xf32, #tpu.memory_space<vmem>>, vector<1x1x256xf32>
    %61 = vector.shape_cast %60 : vector<1x1x256xf32> to vector<1x256xf32>
    %62 = vector.broadcast %61 : vector<1x256xf32> to vector<8x256xf32>
    %63 = arith.mulf %59, %62 : vector<8x256xf32>
    %64 = vector.extract_strided_slice %31 {offsets = [0, 1], sizes = [8, 255], strides = [1, 1]} : vector<8x256xf32> to vector<8x255xf32>
    %65 = vector.extract_strided_slice %31 {offsets = [0, 0], sizes = [8, 1], strides = [1, 1]} : vector<8x256xf32> to vector<8x1xf32>
    %66 = tpu.concatenate %64, %65 in 1 : vector<8x255xf32>, vector<8x1xf32> -> vector<8x256xf32>
    %c5 = arith.constant 5 : index
    %c0_44 = arith.constant 0 : index
    %c0_45 = arith.constant 0 : index
    %67 = vector.load %arg8[%c5, %c0_44, %c0_45] : memref<9x1x256xf32, #tpu.memory_space<vmem>>, vector<1x1x256xf32>
    %68 = vector.shape_cast %67 : vector<1x1x256xf32> to vector<1x256xf32>
    %69 = vector.broadcast %68 : vector<1x256xf32> to vector<8x256xf32>
    %70 = arith.mulf %66, %69 : vector<8x256xf32>
    %71 = vector.extract_strided_slice %31 {offsets = [0, 15], sizes = [8, 241], strides = [1, 1]} : vector<8x256xf32> to vector<8x241xf32>
    %72 = vector.extract_strided_slice %31 {offsets = [0, 0], sizes = [8, 15], strides = [1, 1]} : vector<8x256xf32> to vector<8x15xf32>
    %73 = tpu.concatenate %71, %72 in 1 : vector<8x241xf32>, vector<8x15xf32> -> vector<8x256xf32>
    %c6 = arith.constant 6 : index
    %c0_46 = arith.constant 0 : index
    %c0_47 = arith.constant 0 : index
    %74 = vector.load %arg8[%c6, %c0_46, %c0_47] : memref<9x1x256xf32, #tpu.memory_space<vmem>>, vector<1x1x256xf32>
    %75 = vector.shape_cast %74 : vector<1x1x256xf32> to vector<1x256xf32>
    %76 = vector.broadcast %75 : vector<1x256xf32> to vector<8x256xf32>
    %77 = arith.mulf %73, %76 : vector<8x256xf32>
    %78 = vector.extract_strided_slice %31 {offsets = [0, 16], sizes = [8, 240], strides = [1, 1]} : vector<8x256xf32> to vector<8x240xf32>
    %79 = vector.extract_strided_slice %31 {offsets = [0, 0], sizes = [8, 16], strides = [1, 1]} : vector<8x256xf32> to vector<8x16xf32>
    %80 = tpu.concatenate %78, %79 in 1 : vector<8x240xf32>, vector<8x16xf32> -> vector<8x256xf32>
    %c7 = arith.constant 7 : index
    %c0_48 = arith.constant 0 : index
    %c0_49 = arith.constant 0 : index
    %81 = vector.load %arg8[%c7, %c0_48, %c0_49] : memref<9x1x256xf32, #tpu.memory_space<vmem>>, vector<1x1x256xf32>
    %82 = vector.shape_cast %81 : vector<1x1x256xf32> to vector<1x256xf32>
    %83 = vector.broadcast %82 : vector<1x256xf32> to vector<8x256xf32>
    %84 = arith.mulf %80, %83 : vector<8x256xf32>
    %85 = vector.extract_strided_slice %31 {offsets = [0, 17], sizes = [8, 239], strides = [1, 1]} : vector<8x256xf32> to vector<8x239xf32>
    %86 = vector.extract_strided_slice %31 {offsets = [0, 0], sizes = [8, 17], strides = [1, 1]} : vector<8x256xf32> to vector<8x17xf32>
    %87 = tpu.concatenate %85, %86 in 1 : vector<8x239xf32>, vector<8x17xf32> -> vector<8x256xf32>
    %c8 = arith.constant 8 : index
    %c0_50 = arith.constant 0 : index
    %c0_51 = arith.constant 0 : index
    %88 = vector.load %arg8[%c8, %c0_50, %c0_51] : memref<9x1x256xf32, #tpu.memory_space<vmem>>, vector<1x1x256xf32>
    %89 = vector.shape_cast %88 : vector<1x1x256xf32> to vector<1x256xf32>
    %90 = vector.broadcast %89 : vector<1x256xf32> to vector<8x256xf32>
    %91 = arith.mulf %87, %90 : vector<8x256xf32>
    %92 = tpu.concatenate %42, %49, %56, %63, %31, %70, %77, %84, %91 in 0 : vector<8x256xf32>, vector<8x256xf32>, vector<8x256xf32>, vector<8x256xf32>, vector<8x256xf32>, vector<8x256xf32>, vector<8x256xf32>, vector<8x256xf32>, vector<8x256xf32> -> vector<72x256xf32>
    %cst_52 = arith.constant dense<0.000000e+00> : vector<8x256xf32>
    %93 = tpu.matmul %33, %92, %cst_52 {dimension_numbers = #tpu.dot_dimension_numbers<[1], [0], [0], [1], [0, 0, 1, 1], [], []>} : vector<8x72xf32>, vector<72x256xf32>, vector<8x256xf32> -> vector<8x256xf32>
    %94 = vector.broadcast %35 : vector<8x1xf32> to vector<8x256xf32>
    %95 = arith.addf %93, %94 : vector<8x256xf32>
    %cst_53 = arith.constant 5.000000e-01 : f32
    %96 = vector.broadcast %cst_53 : f32 to vector<8x256xf32>
    %97 = arith.mulf %96, %95 : vector<8x256xf32>
    %cst_54 = arith.constant 0.707106769 : f32
    %98 = vector.broadcast %cst_54 : f32 to vector<8x256xf32>
    %99 = arith.mulf %95, %98 : vector<8x256xf32>
    %100 = math.absf %99 : vector<8x256xf32>
    %cst_55 = arith.constant 0.327591091 : f32
    %101 = vector.broadcast %cst_55 : f32 to vector<8x256xf32>
    %102 = arith.mulf %101, %100 : vector<8x256xf32>
    %cst_56 = arith.constant 1.000000e+00 : f32
    %103 = vector.broadcast %cst_56 : f32 to vector<8x256xf32>
    %104 = arith.addf %103, %102 : vector<8x256xf32>
    %cst_57 = arith.constant 1.000000e+00 : f32
    %105 = vector.broadcast %cst_57 : f32 to vector<8x256xf32>
    %106 = arith.divf %105, %104 : vector<8x256xf32>
    %cst_58 = arith.constant 1.06140542 : f32
    %107 = vector.broadcast %cst_58 : f32 to vector<8x256xf32>
    %108 = arith.mulf %107, %106 : vector<8x256xf32>
    %cst_59 = arith.constant -1.45315206 : f32
    %109 = vector.broadcast %cst_59 : f32 to vector<8x256xf32>
    %110 = arith.addf %108, %109 : vector<8x256xf32>
    %111 = arith.mulf %110, %106 : vector<8x256xf32>
    %cst_60 = arith.constant 1.42141378 : f32
    %112 = vector.broadcast %cst_60 : f32 to vector<8x256xf32>
    %113 = arith.addf %111, %112 : vector<8x256xf32>
    %114 = arith.mulf %113, %106 : vector<8x256xf32>
    %cst_61 = arith.constant -0.284496725 : f32
    %115 = vector.broadcast %cst_61 : f32 to vector<8x256xf32>
    %116 = arith.addf %114, %115 : vector<8x256xf32>
    %117 = arith.mulf %116, %106 : vector<8x256xf32>
    %cst_62 = arith.constant 0.254829586 : f32
    %118 = vector.broadcast %cst_62 : f32 to vector<8x256xf32>
    %119 = arith.addf %117, %118 : vector<8x256xf32>
    %120 = arith.mulf %119, %106 : vector<8x256xf32>
    %cst_63 = arith.constant 0.000000e+00 : f32
    %121 = vector.broadcast %cst_63 : f32 to vector<8x256xf32>
    %122 = arith.subf %121, %100 : vector<8x256xf32>
    %123 = arith.mulf %122, %100 : vector<8x256xf32>
    %124 = math.exp %123 : vector<8x256xf32>
    %125 = arith.mulf %120, %124 : vector<8x256xf32>
    %cst_64 = arith.constant 1.000000e+00 : f32
    %126 = vector.broadcast %cst_64 : f32 to vector<8x256xf32>
    %127 = arith.subf %126, %125 : vector<8x256xf32>
    %cst_65 = arith.constant 0.000000e+00 : f32
    %128 = vector.broadcast %cst_65 : f32 to vector<8x256xf32>
    %129 = arith.cmpf olt, %99, %128 : vector<8x256xf32>
    %cst_66 = arith.constant 0.000000e+00 : f32
    %130 = vector.broadcast %cst_66 : f32 to vector<8x256xf32>
    %131 = arith.subf %130, %127 : vector<8x256xf32>
    %132 = arith.select %129, %131, %127 : vector<8x256xi1>, vector<8x256xf32>
    %cst_67 = arith.constant 1.000000e+00 : f32
    %133 = vector.broadcast %cst_67 : f32 to vector<8x256xf32>
    %134 = arith.addf %133, %132 : vector<8x256xf32>
    %135 = arith.mulf %97, %134 : vector<8x256xf32>
    %c1_68 = arith.constant 1 : index
    %c0_69 = arith.constant 0 : index
    %c0_70 = arith.constant 0 : index
    %136 = vector.load %arg6[%c1_68, %c0_69, %c0_70] : memref<4x8x72xf32, #tpu.memory_space<vmem>>, vector<1x8x72xf32>
    %137 = vector.shape_cast %136 : vector<1x8x72xf32> to vector<8x72xf32>
    %c2_71 = arith.constant 2 : index
    %c0_72 = arith.constant 0 : index
    %c0_73 = arith.constant 0 : index
    %138 = vector.load %arg7[%c2_71, %c0_72, %c0_73] : memref<5x8x1xf32, #tpu.memory_space<vmem>>, vector<1x8x1xf32>
    %139 = vector.shape_cast %138 : vector<1x8x1xf32> to vector<8x1xf32>
    %140 = vector.extract_strided_slice %135 {offsets = [0, 239], sizes = [8, 17], strides = [1, 1]} : vector<8x256xf32> to vector<8x17xf32>
    %141 = vector.extract_strided_slice %135 {offsets = [0, 0], sizes = [8, 239], strides = [1, 1]} : vector<8x256xf32> to vector<8x239xf32>
    %142 = tpu.concatenate %140, %141 in 1 : vector<8x17xf32>, vector<8x239xf32> -> vector<8x256xf32>
    %c0_74 = arith.constant 0 : index
    %c0_75 = arith.constant 0 : index
    %c0_76 = arith.constant 0 : index
    %143 = vector.load %arg8[%c0_74, %c0_75, %c0_76] : memref<9x1x256xf32, #tpu.memory_space<vmem>>, vector<1x1x256xf32>
    %144 = vector.shape_cast %143 : vector<1x1x256xf32> to vector<1x256xf32>
    %145 = vector.broadcast %144 : vector<1x256xf32> to vector<8x256xf32>
    %146 = arith.mulf %142, %145 : vector<8x256xf32>
    %147 = vector.extract_strided_slice %135 {offsets = [0, 240], sizes = [8, 16], strides = [1, 1]} : vector<8x256xf32> to vector<8x16xf32>
    %148 = vector.extract_strided_slice %135 {offsets = [0, 0], sizes = [8, 240], strides = [1, 1]} : vector<8x256xf32> to vector<8x240xf32>
    %149 = tpu.concatenate %147, %148 in 1 : vector<8x16xf32>, vector<8x240xf32> -> vector<8x256xf32>
    %c1_77 = arith.constant 1 : index
    %c0_78 = arith.constant 0 : index
    %c0_79 = arith.constant 0 : index
    %150 = vector.load %arg8[%c1_77, %c0_78, %c0_79] : memref<9x1x256xf32, #tpu.memory_space<vmem>>, vector<1x1x256xf32>
    %151 = vector.shape_cast %150 : vector<1x1x256xf32> to vector<1x256xf32>
    %152 = vector.broadcast %151 : vector<1x256xf32> to vector<8x256xf32>
    %153 = arith.mulf %149, %152 : vector<8x256xf32>
    %154 = vector.extract_strided_slice %135 {offsets = [0, 241], sizes = [8, 15], strides = [1, 1]} : vector<8x256xf32> to vector<8x15xf32>
    %155 = vector.extract_strided_slice %135 {offsets = [0, 0], sizes = [8, 241], strides = [1, 1]} : vector<8x256xf32> to vector<8x241xf32>
    %156 = tpu.concatenate %154, %155 in 1 : vector<8x15xf32>, vector<8x241xf32> -> vector<8x256xf32>
    %c2_80 = arith.constant 2 : index
    %c0_81 = arith.constant 0 : index
    %c0_82 = arith.constant 0 : index
    %157 = vector.load %arg8[%c2_80, %c0_81, %c0_82] : memref<9x1x256xf32, #tpu.memory_space<vmem>>, vector<1x1x256xf32>
    %158 = vector.shape_cast %157 : vector<1x1x256xf32> to vector<1x256xf32>
    %159 = vector.broadcast %158 : vector<1x256xf32> to vector<8x256xf32>
    %160 = arith.mulf %156, %159 : vector<8x256xf32>
    %161 = vector.extract_strided_slice %135 {offsets = [0, 255], sizes = [8, 1], strides = [1, 1]} : vector<8x256xf32> to vector<8x1xf32>
    %162 = vector.extract_strided_slice %135 {offsets = [0, 0], sizes = [8, 255], strides = [1, 1]} : vector<8x256xf32> to vector<8x255xf32>
    %163 = tpu.concatenate %161, %162 in 1 : vector<8x1xf32>, vector<8x255xf32> -> vector<8x256xf32>
    %c3_83 = arith.constant 3 : index
    %c0_84 = arith.constant 0 : index
    %c0_85 = arith.constant 0 : index
    %164 = vector.load %arg8[%c3_83, %c0_84, %c0_85] : memref<9x1x256xf32, #tpu.memory_space<vmem>>, vector<1x1x256xf32>
    %165 = vector.shape_cast %164 : vector<1x1x256xf32> to vector<1x256xf32>
    %166 = vector.broadcast %165 : vector<1x256xf32> to vector<8x256xf32>
    %167 = arith.mulf %163, %166 : vector<8x256xf32>
    %168 = vector.extract_strided_slice %135 {offsets = [0, 1], sizes = [8, 255], strides = [1, 1]} : vector<8x256xf32> to vector<8x255xf32>
    %169 = vector.extract_strided_slice %135 {offsets = [0, 0], sizes = [8, 1], strides = [1, 1]} : vector<8x256xf32> to vector<8x1xf32>
    %170 = tpu.concatenate %168, %169 in 1 : vector<8x255xf32>, vector<8x1xf32> -> vector<8x256xf32>
    %c5_86 = arith.constant 5 : index
    %c0_87 = arith.constant 0 : index
    %c0_88 = arith.constant 0 : index
    %171 = vector.load %arg8[%c5_86, %c0_87, %c0_88] : memref<9x1x256xf32, #tpu.memory_space<vmem>>, vector<1x1x256xf32>
    %172 = vector.shape_cast %171 : vector<1x1x256xf32> to vector<1x256xf32>
    %173 = vector.broadcast %172 : vector<1x256xf32> to vector<8x256xf32>
    %174 = arith.mulf %170, %173 : vector<8x256xf32>
    %175 = vector.extract_strided_slice %135 {offsets = [0, 15], sizes = [8, 241], strides = [1, 1]} : vector<8x256xf32> to vector<8x241xf32>
    %176 = vector.extract_strided_slice %135 {offsets = [0, 0], sizes = [8, 15], strides = [1, 1]} : vector<8x256xf32> to vector<8x15xf32>
    %177 = tpu.concatenate %175, %176 in 1 : vector<8x241xf32>, vector<8x15xf32> -> vector<8x256xf32>
    %c6_89 = arith.constant 6 : index
    %c0_90 = arith.constant 0 : index
    %c0_91 = arith.constant 0 : index
    %178 = vector.load %arg8[%c6_89, %c0_90, %c0_91] : memref<9x1x256xf32, #tpu.memory_space<vmem>>, vector<1x1x256xf32>
    %179 = vector.shape_cast %178 : vector<1x1x256xf32> to vector<1x256xf32>
    %180 = vector.broadcast %179 : vector<1x256xf32> to vector<8x256xf32>
    %181 = arith.mulf %177, %180 : vector<8x256xf32>
    %182 = vector.extract_strided_slice %135 {offsets = [0, 16], sizes = [8, 240], strides = [1, 1]} : vector<8x256xf32> to vector<8x240xf32>
    %183 = vector.extract_strided_slice %135 {offsets = [0, 0], sizes = [8, 16], strides = [1, 1]} : vector<8x256xf32> to vector<8x16xf32>
    %184 = tpu.concatenate %182, %183 in 1 : vector<8x240xf32>, vector<8x16xf32> -> vector<8x256xf32>
    %c7_92 = arith.constant 7 : index
    %c0_93 = arith.constant 0 : index
    %c0_94 = arith.constant 0 : index
    %185 = vector.load %arg8[%c7_92, %c0_93, %c0_94] : memref<9x1x256xf32, #tpu.memory_space<vmem>>, vector<1x1x256xf32>
    %186 = vector.shape_cast %185 : vector<1x1x256xf32> to vector<1x256xf32>
    %187 = vector.broadcast %186 : vector<1x256xf32> to vector<8x256xf32>
    %188 = arith.mulf %184, %187 : vector<8x256xf32>
    %189 = vector.extract_strided_slice %135 {offsets = [0, 17], sizes = [8, 239], strides = [1, 1]} : vector<8x256xf32> to vector<8x239xf32>
    %190 = vector.extract_strided_slice %135 {offsets = [0, 0], sizes = [8, 17], strides = [1, 1]} : vector<8x256xf32> to vector<8x17xf32>
    %191 = tpu.concatenate %189, %190 in 1 : vector<8x239xf32>, vector<8x17xf32> -> vector<8x256xf32>
    %c8_95 = arith.constant 8 : index
    %c0_96 = arith.constant 0 : index
    %c0_97 = arith.constant 0 : index
    %192 = vector.load %arg8[%c8_95, %c0_96, %c0_97] : memref<9x1x256xf32, #tpu.memory_space<vmem>>, vector<1x1x256xf32>
    %193 = vector.shape_cast %192 : vector<1x1x256xf32> to vector<1x256xf32>
    %194 = vector.broadcast %193 : vector<1x256xf32> to vector<8x256xf32>
    %195 = arith.mulf %191, %194 : vector<8x256xf32>
    %196 = tpu.concatenate %146, %153, %160, %167, %135, %174, %181, %188, %195 in 0 : vector<8x256xf32>, vector<8x256xf32>, vector<8x256xf32>, vector<8x256xf32>, vector<8x256xf32>, vector<8x256xf32>, vector<8x256xf32>, vector<8x256xf32>, vector<8x256xf32> -> vector<72x256xf32>
    %cst_98 = arith.constant dense<0.000000e+00> : vector<8x256xf32>
    %197 = tpu.matmul %137, %196, %cst_98 {dimension_numbers = #tpu.dot_dimension_numbers<[1], [0], [0], [1], [0, 0, 1, 1], [], []>} : vector<8x72xf32>, vector<72x256xf32>, vector<8x256xf32> -> vector<8x256xf32>
    %198 = vector.broadcast %139 : vector<8x1xf32> to vector<8x256xf32>
    %199 = arith.addf %197, %198 : vector<8x256xf32>
    %cst_99 = arith.constant 5.000000e-01 : f32
    %200 = vector.broadcast %cst_99 : f32 to vector<8x256xf32>
    %201 = arith.mulf %200, %199 : vector<8x256xf32>
    %cst_100 = arith.constant 0.707106769 : f32
    %202 = vector.broadcast %cst_100 : f32 to vector<8x256xf32>
    %203 = arith.mulf %199, %202 : vector<8x256xf32>
    %204 = math.absf %203 : vector<8x256xf32>
    %cst_101 = arith.constant 0.327591091 : f32
    %205 = vector.broadcast %cst_101 : f32 to vector<8x256xf32>
    %206 = arith.mulf %205, %204 : vector<8x256xf32>
    %cst_102 = arith.constant 1.000000e+00 : f32
    %207 = vector.broadcast %cst_102 : f32 to vector<8x256xf32>
    %208 = arith.addf %207, %206 : vector<8x256xf32>
    %cst_103 = arith.constant 1.000000e+00 : f32
    %209 = vector.broadcast %cst_103 : f32 to vector<8x256xf32>
    %210 = arith.divf %209, %208 : vector<8x256xf32>
    %cst_104 = arith.constant 1.06140542 : f32
    %211 = vector.broadcast %cst_104 : f32 to vector<8x256xf32>
    %212 = arith.mulf %211, %210 : vector<8x256xf32>
    %cst_105 = arith.constant -1.45315206 : f32
    %213 = vector.broadcast %cst_105 : f32 to vector<8x256xf32>
    %214 = arith.addf %212, %213 : vector<8x256xf32>
    %215 = arith.mulf %214, %210 : vector<8x256xf32>
    %cst_106 = arith.constant 1.42141378 : f32
    %216 = vector.broadcast %cst_106 : f32 to vector<8x256xf32>
    %217 = arith.addf %215, %216 : vector<8x256xf32>
    %218 = arith.mulf %217, %210 : vector<8x256xf32>
    %cst_107 = arith.constant -0.284496725 : f32
    %219 = vector.broadcast %cst_107 : f32 to vector<8x256xf32>
    %220 = arith.addf %218, %219 : vector<8x256xf32>
    %221 = arith.mulf %220, %210 : vector<8x256xf32>
    %cst_108 = arith.constant 0.254829586 : f32
    %222 = vector.broadcast %cst_108 : f32 to vector<8x256xf32>
    %223 = arith.addf %221, %222 : vector<8x256xf32>
    %224 = arith.mulf %223, %210 : vector<8x256xf32>
    %cst_109 = arith.constant 0.000000e+00 : f32
    %225 = vector.broadcast %cst_109 : f32 to vector<8x256xf32>
    %226 = arith.subf %225, %204 : vector<8x256xf32>
    %227 = arith.mulf %226, %204 : vector<8x256xf32>
    %228 = math.exp %227 : vector<8x256xf32>
    %229 = arith.mulf %224, %228 : vector<8x256xf32>
    %cst_110 = arith.constant 1.000000e+00 : f32
    %230 = vector.broadcast %cst_110 : f32 to vector<8x256xf32>
    %231 = arith.subf %230, %229 : vector<8x256xf32>
    %cst_111 = arith.constant 0.000000e+00 : f32
    %232 = vector.broadcast %cst_111 : f32 to vector<8x256xf32>
    %233 = arith.cmpf olt, %203, %232 : vector<8x256xf32>
    %cst_112 = arith.constant 0.000000e+00 : f32
    %234 = vector.broadcast %cst_112 : f32 to vector<8x256xf32>
    %235 = arith.subf %234, %231 : vector<8x256xf32>
    %236 = arith.select %233, %235, %231 : vector<8x256xi1>, vector<8x256xf32>
    %cst_113 = arith.constant 1.000000e+00 : f32
    %237 = vector.broadcast %cst_113 : f32 to vector<8x256xf32>
    %238 = arith.addf %237, %236 : vector<8x256xf32>
    %239 = arith.mulf %201, %238 : vector<8x256xf32>
    %240 = arith.addf %239, %31 : vector<8x256xf32>
    %c2_114 = arith.constant 2 : index
    %c0_115 = arith.constant 0 : index
    %c0_116 = arith.constant 0 : index
    %241 = vector.load %arg6[%c2_114, %c0_115, %c0_116] : memref<4x8x72xf32, #tpu.memory_space<vmem>>, vector<1x8x72xf32>
    %242 = vector.shape_cast %241 : vector<1x8x72xf32> to vector<8x72xf32>
    %c3_117 = arith.constant 3 : index
    %c0_118 = arith.constant 0 : index
    %c0_119 = arith.constant 0 : index
    %243 = vector.load %arg7[%c3_117, %c0_118, %c0_119] : memref<5x8x1xf32, #tpu.memory_space<vmem>>, vector<1x8x1xf32>
    %244 = vector.shape_cast %243 : vector<1x8x1xf32> to vector<8x1xf32>
    %245 = vector.extract_strided_slice %240 {offsets = [0, 239], sizes = [8, 17], strides = [1, 1]} : vector<8x256xf32> to vector<8x17xf32>
    %246 = vector.extract_strided_slice %240 {offsets = [0, 0], sizes = [8, 239], strides = [1, 1]} : vector<8x256xf32> to vector<8x239xf32>
    %247 = tpu.concatenate %245, %246 in 1 : vector<8x17xf32>, vector<8x239xf32> -> vector<8x256xf32>
    %c0_120 = arith.constant 0 : index
    %c0_121 = arith.constant 0 : index
    %c0_122 = arith.constant 0 : index
    %248 = vector.load %arg8[%c0_120, %c0_121, %c0_122] : memref<9x1x256xf32, #tpu.memory_space<vmem>>, vector<1x1x256xf32>
    %249 = vector.shape_cast %248 : vector<1x1x256xf32> to vector<1x256xf32>
    %250 = vector.broadcast %249 : vector<1x256xf32> to vector<8x256xf32>
    %251 = arith.mulf %247, %250 : vector<8x256xf32>
    %252 = vector.extract_strided_slice %240 {offsets = [0, 240], sizes = [8, 16], strides = [1, 1]} : vector<8x256xf32> to vector<8x16xf32>
    %253 = vector.extract_strided_slice %240 {offsets = [0, 0], sizes = [8, 240], strides = [1, 1]} : vector<8x256xf32> to vector<8x240xf32>
    %254 = tpu.concatenate %252, %253 in 1 : vector<8x16xf32>, vector<8x240xf32> -> vector<8x256xf32>
    %c1_123 = arith.constant 1 : index
    %c0_124 = arith.constant 0 : index
    %c0_125 = arith.constant 0 : index
    %255 = vector.load %arg8[%c1_123, %c0_124, %c0_125] : memref<9x1x256xf32, #tpu.memory_space<vmem>>, vector<1x1x256xf32>
    %256 = vector.shape_cast %255 : vector<1x1x256xf32> to vector<1x256xf32>
    %257 = vector.broadcast %256 : vector<1x256xf32> to vector<8x256xf32>
    %258 = arith.mulf %254, %257 : vector<8x256xf32>
    %259 = vector.extract_strided_slice %240 {offsets = [0, 241], sizes = [8, 15], strides = [1, 1]} : vector<8x256xf32> to vector<8x15xf32>
    %260 = vector.extract_strided_slice %240 {offsets = [0, 0], sizes = [8, 241], strides = [1, 1]} : vector<8x256xf32> to vector<8x241xf32>
    %261 = tpu.concatenate %259, %260 in 1 : vector<8x15xf32>, vector<8x241xf32> -> vector<8x256xf32>
    %c2_126 = arith.constant 2 : index
    %c0_127 = arith.constant 0 : index
    %c0_128 = arith.constant 0 : index
    %262 = vector.load %arg8[%c2_126, %c0_127, %c0_128] : memref<9x1x256xf32, #tpu.memory_space<vmem>>, vector<1x1x256xf32>
    %263 = vector.shape_cast %262 : vector<1x1x256xf32> to vector<1x256xf32>
    %264 = vector.broadcast %263 : vector<1x256xf32> to vector<8x256xf32>
    %265 = arith.mulf %261, %264 : vector<8x256xf32>
    %266 = vector.extract_strided_slice %240 {offsets = [0, 255], sizes = [8, 1], strides = [1, 1]} : vector<8x256xf32> to vector<8x1xf32>
    %267 = vector.extract_strided_slice %240 {offsets = [0, 0], sizes = [8, 255], strides = [1, 1]} : vector<8x256xf32> to vector<8x255xf32>
    %268 = tpu.concatenate %266, %267 in 1 : vector<8x1xf32>, vector<8x255xf32> -> vector<8x256xf32>
    %c3_129 = arith.constant 3 : index
    %c0_130 = arith.constant 0 : index
    %c0_131 = arith.constant 0 : index
    %269 = vector.load %arg8[%c3_129, %c0_130, %c0_131] : memref<9x1x256xf32, #tpu.memory_space<vmem>>, vector<1x1x256xf32>
    %270 = vector.shape_cast %269 : vector<1x1x256xf32> to vector<1x256xf32>
    %271 = vector.broadcast %270 : vector<1x256xf32> to vector<8x256xf32>
    %272 = arith.mulf %268, %271 : vector<8x256xf32>
    %273 = vector.extract_strided_slice %240 {offsets = [0, 1], sizes = [8, 255], strides = [1, 1]} : vector<8x256xf32> to vector<8x255xf32>
    %274 = vector.extract_strided_slice %240 {offsets = [0, 0], sizes = [8, 1], strides = [1, 1]} : vector<8x256xf32> to vector<8x1xf32>
    %275 = tpu.concatenate %273, %274 in 1 : vector<8x255xf32>, vector<8x1xf32> -> vector<8x256xf32>
    %c5_132 = arith.constant 5 : index
    %c0_133 = arith.constant 0 : index
    %c0_134 = arith.constant 0 : index
    %276 = vector.load %arg8[%c5_132, %c0_133, %c0_134] : memref<9x1x256xf32, #tpu.memory_space<vmem>>, vector<1x1x256xf32>
    %277 = vector.shape_cast %276 : vector<1x1x256xf32> to vector<1x256xf32>
    %278 = vector.broadcast %277 : vector<1x256xf32> to vector<8x256xf32>
    %279 = arith.mulf %275, %278 : vector<8x256xf32>
    %280 = vector.extract_strided_slice %240 {offsets = [0, 15], sizes = [8, 241], strides = [1, 1]} : vector<8x256xf32> to vector<8x241xf32>
    %281 = vector.extract_strided_slice %240 {offsets = [0, 0], sizes = [8, 15], strides = [1, 1]} : vector<8x256xf32> to vector<8x15xf32>
    %282 = tpu.concatenate %280, %281 in 1 : vector<8x241xf32>, vector<8x15xf32> -> vector<8x256xf32>
    %c6_135 = arith.constant 6 : index
    %c0_136 = arith.constant 0 : index
    %c0_137 = arith.constant 0 : index
    %283 = vector.load %arg8[%c6_135, %c0_136, %c0_137] : memref<9x1x256xf32, #tpu.memory_space<vmem>>, vector<1x1x256xf32>
    %284 = vector.shape_cast %283 : vector<1x1x256xf32> to vector<1x256xf32>
    %285 = vector.broadcast %284 : vector<1x256xf32> to vector<8x256xf32>
    %286 = arith.mulf %282, %285 : vector<8x256xf32>
    %287 = vector.extract_strided_slice %240 {offsets = [0, 16], sizes = [8, 240], strides = [1, 1]} : vector<8x256xf32> to vector<8x240xf32>
    %288 = vector.extract_strided_slice %240 {offsets = [0, 0], sizes = [8, 16], strides = [1, 1]} : vector<8x256xf32> to vector<8x16xf32>
    %289 = tpu.concatenate %287, %288 in 1 : vector<8x240xf32>, vector<8x16xf32> -> vector<8x256xf32>
    %c7_138 = arith.constant 7 : index
    %c0_139 = arith.constant 0 : index
    %c0_140 = arith.constant 0 : index
    %290 = vector.load %arg8[%c7_138, %c0_139, %c0_140] : memref<9x1x256xf32, #tpu.memory_space<vmem>>, vector<1x1x256xf32>
    %291 = vector.shape_cast %290 : vector<1x1x256xf32> to vector<1x256xf32>
    %292 = vector.broadcast %291 : vector<1x256xf32> to vector<8x256xf32>
    %293 = arith.mulf %289, %292 : vector<8x256xf32>
    %294 = vector.extract_strided_slice %240 {offsets = [0, 17], sizes = [8, 239], strides = [1, 1]} : vector<8x256xf32> to vector<8x239xf32>
    %295 = vector.extract_strided_slice %240 {offsets = [0, 0], sizes = [8, 17], strides = [1, 1]} : vector<8x256xf32> to vector<8x17xf32>
    %296 = tpu.concatenate %294, %295 in 1 : vector<8x239xf32>, vector<8x17xf32> -> vector<8x256xf32>
    %c8_141 = arith.constant 8 : index
    %c0_142 = arith.constant 0 : index
    %c0_143 = arith.constant 0 : index
    %297 = vector.load %arg8[%c8_141, %c0_142, %c0_143] : memref<9x1x256xf32, #tpu.memory_space<vmem>>, vector<1x1x256xf32>
    %298 = vector.shape_cast %297 : vector<1x1x256xf32> to vector<1x256xf32>
    %299 = vector.broadcast %298 : vector<1x256xf32> to vector<8x256xf32>
    %300 = arith.mulf %296, %299 : vector<8x256xf32>
    %301 = tpu.concatenate %251, %258, %265, %272, %240, %279, %286, %293, %300 in 0 : vector<8x256xf32>, vector<8x256xf32>, vector<8x256xf32>, vector<8x256xf32>, vector<8x256xf32>, vector<8x256xf32>, vector<8x256xf32>, vector<8x256xf32>, vector<8x256xf32> -> vector<72x256xf32>
    %cst_144 = arith.constant dense<0.000000e+00> : vector<8x256xf32>
    %302 = tpu.matmul %242, %301, %cst_144 {dimension_numbers = #tpu.dot_dimension_numbers<[1], [0], [0], [1], [0, 0, 1, 1], [], []>} : vector<8x72xf32>, vector<72x256xf32>, vector<8x256xf32> -> vector<8x256xf32>
    %303 = vector.broadcast %244 : vector<8x1xf32> to vector<8x256xf32>
    %304 = arith.addf %302, %303 : vector<8x256xf32>
    %cst_145 = arith.constant 5.000000e-01 : f32
    %305 = vector.broadcast %cst_145 : f32 to vector<8x256xf32>
    %306 = arith.mulf %305, %304 : vector<8x256xf32>
    %cst_146 = arith.constant 0.707106769 : f32
    %307 = vector.broadcast %cst_146 : f32 to vector<8x256xf32>
    %308 = arith.mulf %304, %307 : vector<8x256xf32>
    %309 = math.absf %308 : vector<8x256xf32>
    %cst_147 = arith.constant 0.327591091 : f32
    %310 = vector.broadcast %cst_147 : f32 to vector<8x256xf32>
    %311 = arith.mulf %310, %309 : vector<8x256xf32>
    %cst_148 = arith.constant 1.000000e+00 : f32
    %312 = vector.broadcast %cst_148 : f32 to vector<8x256xf32>
    %313 = arith.addf %312, %311 : vector<8x256xf32>
    %cst_149 = arith.constant 1.000000e+00 : f32
    %314 = vector.broadcast %cst_149 : f32 to vector<8x256xf32>
    %315 = arith.divf %314, %313 : vector<8x256xf32>
    %cst_150 = arith.constant 1.06140542 : f32
    %316 = vector.broadcast %cst_150 : f32 to vector<8x256xf32>
    %317 = arith.mulf %316, %315 : vector<8x256xf32>
    %cst_151 = arith.constant -1.45315206 : f32
    %318 = vector.broadcast %cst_151 : f32 to vector<8x256xf32>
    %319 = arith.addf %317, %318 : vector<8x256xf32>
    %320 = arith.mulf %319, %315 : vector<8x256xf32>
    %cst_152 = arith.constant 1.42141378 : f32
    %321 = vector.broadcast %cst_152 : f32 to vector<8x256xf32>
    %322 = arith.addf %320, %321 : vector<8x256xf32>
    %323 = arith.mulf %322, %315 : vector<8x256xf32>
    %cst_153 = arith.constant -0.284496725 : f32
    %324 = vector.broadcast %cst_153 : f32 to vector<8x256xf32>
    %325 = arith.addf %323, %324 : vector<8x256xf32>
    %326 = arith.mulf %325, %315 : vector<8x256xf32>
    %cst_154 = arith.constant 0.254829586 : f32
    %327 = vector.broadcast %cst_154 : f32 to vector<8x256xf32>
    %328 = arith.addf %326, %327 : vector<8x256xf32>
    %329 = arith.mulf %328, %315 : vector<8x256xf32>
    %cst_155 = arith.constant 0.000000e+00 : f32
    %330 = vector.broadcast %cst_155 : f32 to vector<8x256xf32>
    %331 = arith.subf %330, %309 : vector<8x256xf32>
    %332 = arith.mulf %331, %309 : vector<8x256xf32>
    %333 = math.exp %332 : vector<8x256xf32>
    %334 = arith.mulf %329, %333 : vector<8x256xf32>
    %cst_156 = arith.constant 1.000000e+00 : f32
    %335 = vector.broadcast %cst_156 : f32 to vector<8x256xf32>
    %336 = arith.subf %335, %334 : vector<8x256xf32>
    %cst_157 = arith.constant 0.000000e+00 : f32
    %337 = vector.broadcast %cst_157 : f32 to vector<8x256xf32>
    %338 = arith.cmpf olt, %308, %337 : vector<8x256xf32>
    %cst_158 = arith.constant 0.000000e+00 : f32
    %339 = vector.broadcast %cst_158 : f32 to vector<8x256xf32>
    %340 = arith.subf %339, %336 : vector<8x256xf32>
    %341 = arith.select %338, %340, %336 : vector<8x256xi1>, vector<8x256xf32>
    %cst_159 = arith.constant 1.000000e+00 : f32
    %342 = vector.broadcast %cst_159 : f32 to vector<8x256xf32>
    %343 = arith.addf %342, %341 : vector<8x256xf32>
    %344 = arith.mulf %306, %343 : vector<8x256xf32>
    %c3_160 = arith.constant 3 : index
    %c0_161 = arith.constant 0 : index
    %c0_162 = arith.constant 0 : index
    %345 = vector.load %arg6[%c3_160, %c0_161, %c0_162] : memref<4x8x72xf32, #tpu.memory_space<vmem>>, vector<1x8x72xf32>
    %346 = vector.shape_cast %345 : vector<1x8x72xf32> to vector<8x72xf32>
    %c4 = arith.constant 4 : index
    %c0_163 = arith.constant 0 : index
    %c0_164 = arith.constant 0 : index
    %347 = vector.load %arg7[%c4, %c0_163, %c0_164] : memref<5x8x1xf32, #tpu.memory_space<vmem>>, vector<1x8x1xf32>
    %348 = vector.shape_cast %347 : vector<1x8x1xf32> to vector<8x1xf32>
    %349 = vector.extract_strided_slice %344 {offsets = [0, 239], sizes = [8, 17], strides = [1, 1]} : vector<8x256xf32> to vector<8x17xf32>
    %350 = vector.extract_strided_slice %344 {offsets = [0, 0], sizes = [8, 239], strides = [1, 1]} : vector<8x256xf32> to vector<8x239xf32>
    %351 = tpu.concatenate %349, %350 in 1 : vector<8x17xf32>, vector<8x239xf32> -> vector<8x256xf32>
    %c0_165 = arith.constant 0 : index
    %c0_166 = arith.constant 0 : index
    %c0_167 = arith.constant 0 : index
    %352 = vector.load %arg8[%c0_165, %c0_166, %c0_167] : memref<9x1x256xf32, #tpu.memory_space<vmem>>, vector<1x1x256xf32>
    %353 = vector.shape_cast %352 : vector<1x1x256xf32> to vector<1x256xf32>
    %354 = vector.broadcast %353 : vector<1x256xf32> to vector<8x256xf32>
    %355 = arith.mulf %351, %354 : vector<8x256xf32>
    %356 = vector.extract_strided_slice %344 {offsets = [0, 240], sizes = [8, 16], strides = [1, 1]} : vector<8x256xf32> to vector<8x16xf32>
    %357 = vector.extract_strided_slice %344 {offsets = [0, 0], sizes = [8, 240], strides = [1, 1]} : vector<8x256xf32> to vector<8x240xf32>
    %358 = tpu.concatenate %356, %357 in 1 : vector<8x16xf32>, vector<8x240xf32> -> vector<8x256xf32>
    %c1_168 = arith.constant 1 : index
    %c0_169 = arith.constant 0 : index
    %c0_170 = arith.constant 0 : index
    %359 = vector.load %arg8[%c1_168, %c0_169, %c0_170] : memref<9x1x256xf32, #tpu.memory_space<vmem>>, vector<1x1x256xf32>
    %360 = vector.shape_cast %359 : vector<1x1x256xf32> to vector<1x256xf32>
    %361 = vector.broadcast %360 : vector<1x256xf32> to vector<8x256xf32>
    %362 = arith.mulf %358, %361 : vector<8x256xf32>
    %363 = vector.extract_strided_slice %344 {offsets = [0, 241], sizes = [8, 15], strides = [1, 1]} : vector<8x256xf32> to vector<8x15xf32>
    %364 = vector.extract_strided_slice %344 {offsets = [0, 0], sizes = [8, 241], strides = [1, 1]} : vector<8x256xf32> to vector<8x241xf32>
    %365 = tpu.concatenate %363, %364 in 1 : vector<8x15xf32>, vector<8x241xf32> -> vector<8x256xf32>
    %c2_171 = arith.constant 2 : index
    %c0_172 = arith.constant 0 : index
    %c0_173 = arith.constant 0 : index
    %366 = vector.load %arg8[%c2_171, %c0_172, %c0_173] : memref<9x1x256xf32, #tpu.memory_space<vmem>>, vector<1x1x256xf32>
    %367 = vector.shape_cast %366 : vector<1x1x256xf32> to vector<1x256xf32>
    %368 = vector.broadcast %367 : vector<1x256xf32> to vector<8x256xf32>
    %369 = arith.mulf %365, %368 : vector<8x256xf32>
    %370 = vector.extract_strided_slice %344 {offsets = [0, 255], sizes = [8, 1], strides = [1, 1]} : vector<8x256xf32> to vector<8x1xf32>
    %371 = vector.extract_strided_slice %344 {offsets = [0, 0], sizes = [8, 255], strides = [1, 1]} : vector<8x256xf32> to vector<8x255xf32>
    %372 = tpu.concatenate %370, %371 in 1 : vector<8x1xf32>, vector<8x255xf32> -> vector<8x256xf32>
    %c3_174 = arith.constant 3 : index
    %c0_175 = arith.constant 0 : index
    %c0_176 = arith.constant 0 : index
    %373 = vector.load %arg8[%c3_174, %c0_175, %c0_176] : memref<9x1x256xf32, #tpu.memory_space<vmem>>, vector<1x1x256xf32>
    %374 = vector.shape_cast %373 : vector<1x1x256xf32> to vector<1x256xf32>
    %375 = vector.broadcast %374 : vector<1x256xf32> to vector<8x256xf32>
    %376 = arith.mulf %372, %375 : vector<8x256xf32>
    %377 = vector.extract_strided_slice %344 {offsets = [0, 1], sizes = [8, 255], strides = [1, 1]} : vector<8x256xf32> to vector<8x255xf32>
    %378 = vector.extract_strided_slice %344 {offsets = [0, 0], sizes = [8, 1], strides = [1, 1]} : vector<8x256xf32> to vector<8x1xf32>
    %379 = tpu.concatenate %377, %378 in 1 : vector<8x255xf32>, vector<8x1xf32> -> vector<8x256xf32>
    %c5_177 = arith.constant 5 : index
    %c0_178 = arith.constant 0 : index
    %c0_179 = arith.constant 0 : index
    %380 = vector.load %arg8[%c5_177, %c0_178, %c0_179] : memref<9x1x256xf32, #tpu.memory_space<vmem>>, vector<1x1x256xf32>
    %381 = vector.shape_cast %380 : vector<1x1x256xf32> to vector<1x256xf32>
    %382 = vector.broadcast %381 : vector<1x256xf32> to vector<8x256xf32>
    %383 = arith.mulf %379, %382 : vector<8x256xf32>
    %384 = vector.extract_strided_slice %344 {offsets = [0, 15], sizes = [8, 241], strides = [1, 1]} : vector<8x256xf32> to vector<8x241xf32>
    %385 = vector.extract_strided_slice %344 {offsets = [0, 0], sizes = [8, 15], strides = [1, 1]} : vector<8x256xf32> to vector<8x15xf32>
    %386 = tpu.concatenate %384, %385 in 1 : vector<8x241xf32>, vector<8x15xf32> -> vector<8x256xf32>
    %c6_180 = arith.constant 6 : index
    %c0_181 = arith.constant 0 : index
    %c0_182 = arith.constant 0 : index
    %387 = vector.load %arg8[%c6_180, %c0_181, %c0_182] : memref<9x1x256xf32, #tpu.memory_space<vmem>>, vector<1x1x256xf32>
    %388 = vector.shape_cast %387 : vector<1x1x256xf32> to vector<1x256xf32>
    %389 = vector.broadcast %388 : vector<1x256xf32> to vector<8x256xf32>
    %390 = arith.mulf %386, %389 : vector<8x256xf32>
    %391 = vector.extract_strided_slice %344 {offsets = [0, 16], sizes = [8, 240], strides = [1, 1]} : vector<8x256xf32> to vector<8x240xf32>
    %392 = vector.extract_strided_slice %344 {offsets = [0, 0], sizes = [8, 16], strides = [1, 1]} : vector<8x256xf32> to vector<8x16xf32>
    %393 = tpu.concatenate %391, %392 in 1 : vector<8x240xf32>, vector<8x16xf32> -> vector<8x256xf32>
    %c7_183 = arith.constant 7 : index
    %c0_184 = arith.constant 0 : index
    %c0_185 = arith.constant 0 : index
    %394 = vector.load %arg8[%c7_183, %c0_184, %c0_185] : memref<9x1x256xf32, #tpu.memory_space<vmem>>, vector<1x1x256xf32>
    %395 = vector.shape_cast %394 : vector<1x1x256xf32> to vector<1x256xf32>
    %396 = vector.broadcast %395 : vector<1x256xf32> to vector<8x256xf32>
    %397 = arith.mulf %393, %396 : vector<8x256xf32>
    %398 = vector.extract_strided_slice %344 {offsets = [0, 17], sizes = [8, 239], strides = [1, 1]} : vector<8x256xf32> to vector<8x239xf32>
    %399 = vector.extract_strided_slice %344 {offsets = [0, 0], sizes = [8, 17], strides = [1, 1]} : vector<8x256xf32> to vector<8x17xf32>
    %400 = tpu.concatenate %398, %399 in 1 : vector<8x239xf32>, vector<8x17xf32> -> vector<8x256xf32>
    %c8_186 = arith.constant 8 : index
    %c0_187 = arith.constant 0 : index
    %c0_188 = arith.constant 0 : index
    %401 = vector.load %arg8[%c8_186, %c0_187, %c0_188] : memref<9x1x256xf32, #tpu.memory_space<vmem>>, vector<1x1x256xf32>
    %402 = vector.shape_cast %401 : vector<1x1x256xf32> to vector<1x256xf32>
    %403 = vector.broadcast %402 : vector<1x256xf32> to vector<8x256xf32>
    %404 = arith.mulf %400, %403 : vector<8x256xf32>
    %405 = tpu.concatenate %355, %362, %369, %376, %344, %383, %390, %397, %404 in 0 : vector<8x256xf32>, vector<8x256xf32>, vector<8x256xf32>, vector<8x256xf32>, vector<8x256xf32>, vector<8x256xf32>, vector<8x256xf32>, vector<8x256xf32>, vector<8x256xf32> -> vector<72x256xf32>
    %cst_189 = arith.constant dense<0.000000e+00> : vector<8x256xf32>
    %406 = tpu.matmul %346, %405, %cst_189 {dimension_numbers = #tpu.dot_dimension_numbers<[1], [0], [0], [1], [0, 0, 1, 1], [], []>} : vector<8x72xf32>, vector<72x256xf32>, vector<8x256xf32> -> vector<8x256xf32>
    %407 = vector.broadcast %348 : vector<8x1xf32> to vector<8x256xf32>
    %408 = arith.addf %406, %407 : vector<8x256xf32>
    %cst_190 = arith.constant 5.000000e-01 : f32
    %409 = vector.broadcast %cst_190 : f32 to vector<8x256xf32>
    %410 = arith.mulf %409, %408 : vector<8x256xf32>
    %cst_191 = arith.constant 0.707106769 : f32
    %411 = vector.broadcast %cst_191 : f32 to vector<8x256xf32>
    %412 = arith.mulf %408, %411 : vector<8x256xf32>
    %413 = math.absf %412 : vector<8x256xf32>
    %cst_192 = arith.constant 0.327591091 : f32
    %414 = vector.broadcast %cst_192 : f32 to vector<8x256xf32>
    %415 = arith.mulf %414, %413 : vector<8x256xf32>
    %cst_193 = arith.constant 1.000000e+00 : f32
    %416 = vector.broadcast %cst_193 : f32 to vector<8x256xf32>
    %417 = arith.addf %416, %415 : vector<8x256xf32>
    %cst_194 = arith.constant 1.000000e+00 : f32
    %418 = vector.broadcast %cst_194 : f32 to vector<8x256xf32>
    %419 = arith.divf %418, %417 : vector<8x256xf32>
    %cst_195 = arith.constant 1.06140542 : f32
    %420 = vector.broadcast %cst_195 : f32 to vector<8x256xf32>
    %421 = arith.mulf %420, %419 : vector<8x256xf32>
    %cst_196 = arith.constant -1.45315206 : f32
    %422 = vector.broadcast %cst_196 : f32 to vector<8x256xf32>
    %423 = arith.addf %421, %422 : vector<8x256xf32>
    %424 = arith.mulf %423, %419 : vector<8x256xf32>
    %cst_197 = arith.constant 1.42141378 : f32
    %425 = vector.broadcast %cst_197 : f32 to vector<8x256xf32>
    %426 = arith.addf %424, %425 : vector<8x256xf32>
    %427 = arith.mulf %426, %419 : vector<8x256xf32>
    %cst_198 = arith.constant -0.284496725 : f32
    %428 = vector.broadcast %cst_198 : f32 to vector<8x256xf32>
    %429 = arith.addf %427, %428 : vector<8x256xf32>
    %430 = arith.mulf %429, %419 : vector<8x256xf32>
    %cst_199 = arith.constant 0.254829586 : f32
    %431 = vector.broadcast %cst_199 : f32 to vector<8x256xf32>
    %432 = arith.addf %430, %431 : vector<8x256xf32>
    %433 = arith.mulf %432, %419 : vector<8x256xf32>
    %cst_200 = arith.constant 0.000000e+00 : f32
    %434 = vector.broadcast %cst_200 : f32 to vector<8x256xf32>
    %435 = arith.subf %434, %413 : vector<8x256xf32>
    %436 = arith.mulf %435, %413 : vector<8x256xf32>
    %437 = math.exp %436 : vector<8x256xf32>
    %438 = arith.mulf %433, %437 : vector<8x256xf32>
    %cst_201 = arith.constant 1.000000e+00 : f32
    %439 = vector.broadcast %cst_201 : f32 to vector<8x256xf32>
    %440 = arith.subf %439, %438 : vector<8x256xf32>
    %cst_202 = arith.constant 0.000000e+00 : f32
    %441 = vector.broadcast %cst_202 : f32 to vector<8x256xf32>
    %442 = arith.cmpf olt, %412, %441 : vector<8x256xf32>
    %cst_203 = arith.constant 0.000000e+00 : f32
    %443 = vector.broadcast %cst_203 : f32 to vector<8x256xf32>
    %444 = arith.subf %443, %440 : vector<8x256xf32>
    %445 = arith.select %442, %444, %440 : vector<8x256xi1>, vector<8x256xf32>
    %cst_204 = arith.constant 1.000000e+00 : f32
    %446 = vector.broadcast %cst_204 : f32 to vector<8x256xf32>
    %447 = arith.addf %446, %445 : vector<8x256xf32>
    %448 = arith.mulf %410, %447 : vector<8x256xf32>
    %c0_205 = arith.constant 0 : index
    %c0_206 = arith.constant 0 : index
    %c0_207 = arith.constant 0 : index
    %449 = vector.load %arg9[%c0_205, %c0_206, %c0_207] : memref<1x8x256xf32, #tpu.memory_space<vmem>>, vector<1x8x256xf32>
    %450 = vector.shape_cast %449 : vector<1x8x256xf32> to vector<8x256xf32>
    %451 = vector.shape_cast %448 : vector<8x256xf32> to vector<1x8x256xf32>
    tpu.vector_store %arg9[%c0_205, %c0_206, %c0_207], %451 {strides = array<i32>} : memref<1x8x256xf32, #tpu.memory_space<vmem>>, vector<1x8x256xf32>,
    return
  }
  func.func @transform_0(%arg0: i32) -> (i32, i32, i32) {
    %c0_i32 = arith.constant 0 : i32
    %c0_i32_0 = arith.constant 0 : i32
    %c0_i32_1 = arith.constant 0 : i32
    return %arg0, %c0_i32, %c0_i32_0 : i32, i32, i32
  }
  func.func @transform_1(%arg0: i32) -> (i32, i32, i32) {
    %c0_i32 = arith.constant 0 : i32
    %c0_i32_0 = arith.constant 0 : i32
    %c0_i32_1 = arith.constant 0 : i32
    return %arg0, %c0_i32, %c0_i32_0 : i32, i32, i32
  }
  func.func @transform_2(%arg0: i32) -> (i32, i32) {
    %c0_i32 = arith.constant 0 : i32
    %c0_i32_0 = arith.constant 0 : i32
    %c0_i32_1 = arith.constant 0 : i32
    return %c0_i32, %c0_i32_0 : i32, i32
  }
  func.func @transform_3(%arg0: i32) -> (i32, i32) {
    %c0_i32 = arith.constant 0 : i32
    %c0_i32_0 = arith.constant 0 : i32
    %c0_i32_1 = arith.constant 0 : i32
    return %c0_i32, %c0_i32_0 : i32, i32
  }
  func.func @transform_4(%arg0: i32) -> (i32, i32, i32) {
    %c0_i32 = arith.constant 0 : i32
    %c0_i32_0 = arith.constant 0 : i32
    %c0_i32_1 = arith.constant 0 : i32
    %c0_i32_2 = arith.constant 0 : i32
    return %c0_i32, %c0_i32_0, %c0_i32_1 : i32, i32, i32
  }
  func.func @transform_5(%arg0: i32) -> (i32, i32, i32) {
    %c0_i32 = arith.constant 0 : i32
    %c0_i32_0 = arith.constant 0 : i32
    %c0_i32_1 = arith.constant 0 : i32
    %c0_i32_2 = arith.constant 0 : i32
    return %c0_i32, %c0_i32_0, %c0_i32_1 : i32, i32, i32
  }
  func.func @transform_6(%arg0: i32) -> (i32, i32, i32) {
    %c0_i32 = arith.constant 0 : i32
    %c0_i32_0 = arith.constant 0 : i32
    %c0_i32_1 = arith.constant 0 : i32
    %c0_i32_2 = arith.constant 0 : i32
    return %c0_i32, %c0_i32_0, %c0_i32_1 : i32, i32, i32
  }
  func.func @transform_7(%arg0: i32) -> (i32, i32, i32) {
    %c0_i32 = arith.constant 0 : i32
    %c0_i32_0 = arith.constant 0 : i32
    %c0_i32_1 = arith.constant 0 : i32
    %c0_i32_2 = arith.constant 0 : i32
    return %c0_i32, %c0_i32_0, %c0_i32_1 : i32, i32, i32
  }
  func.func @transform_8(%arg0: i32) -> (i32, i32, i32) {
    %c0_i32 = arith.constant 0 : i32
    %c0_i32_0 = arith.constant 0 : i32
    %c0_i32_1 = arith.constant 0 : i32
    return %arg0, %c0_i32, %c0_i32_0 : i32, i32, i32
  }
}

</mosaic_0001>

<bundles_post_ra>
// kernel: upward_block_forward.1
= control target key start
LH: loop header
LB: loop body
LE: loop exit
PB: predicated region body
PF: predicated region fallthrough
CT: control target
= control target key end

     0   :  { %13 = vsyncpa [#allocation3], 0  ;;  %s2398_s27 = smov 0   ;;  %s2864_s0 = inlined_call_operand.vmem [shape: f32[2,4,64], index: 0, kind: input, shape index: {}]   ;;  %s2865_s1 = inlined_call_operand.vmem [shape: f32[2,4,64], index: 1, kind: input, shape index: {}]   ;;  %s2866_s2 = inlined_call_operand.vmem [shape: f32[32,4], index: 2, kind: input, shape index: {}]   ;;  %s2867_s3 = inlined_call_operand.vmem [shape: f32[32,4], index: 3, kind: input, shape index: {}]   ;;  %s2868_s4 = inlined_call_operand.hbm [shape: f32[4,64,256], index: 4, kind: input, shape index: {}]   ;;  %s2869_s5 = inlined_call_operand.vmem [shape: f32[4,8,72], index: 5, kind: input, shape index: {}]   ;;  %s2870_s6 = inlined_call_operand.vmem [shape: f32[5,8,1], index: 6, kind: input, shape index: {}]   ;;  %s2871_s7 = inlined_call_operand.vmem [shape: f32[9,1,256], index: 7, kind: input, shape index: {}]   ;;  %s2872_s8 = inlined_call_operand.vmem [shape: f32[2,8,256], index: 8, kind: output, shape index: {}]  }
   0x1 LB: > { %s2404_s28 = sadd.s32 4294967295, %s2338_s27   ;;  %p2027_p0 = scmp.ge.s32.totalorder %s2338_s27, 1  ;;  %s2338_s27 = sphi %s2398_s27, %s19_s27  }
   0x2   : > { %p228_p1 = scmp.lt.s32.totalorder %s2338_s27, 3  ;;  %s2340_s29 = smov [#allocation2]  }
   0x3   : > { %s246_s30 = sshll.u32 %s2340_s29, 4  ;;  %p2873_p3 = scmp.eq.s32.totalorder %s2404_s28, 0  ;;  %s247_s30 = int_to_ptr.vmem [resolvable:$true] %s246_s30 }
   0x4   : > { %p2408_p2 = pnand %p2027_p0, %p228_p1  ;;  %s2300_s13 = scalar_lea.hbm %s2868_s4, 8192 }
   0x5   : > { %p2301_p6 = scmp.ne.s32.totalorder %s2868_s4, %s2300_s13  ;;  %p2307_p10 = scmp.lt.u32.totalorder %s2300_s13, %s2868_s4 }
   0x6   : > { %s2875_s9 = scalar_select %p2408_p2, 1, 0 }
   0x7   : > { %p2239_p4 = pneg %p2408_p2 }
   0x9   : > { %p2417_p5 = pnand %p2873_p3, %p2239_p4 }
   0xb   : > { %p2302_p7 = pneg %p2417_p5 }
   0xd   : > { %p2303_p8 = pnand %p2302_p7, %p2301_p6 }
   0xf   : > { %p2304_p9 = pneg %p2303_p8 }
  0x11   : > { %p2309_p11 = pnand %p2307_p10, %p2304_p9 }
  0x13   : > { %2312 = shalt.err (!%p2309_p11)
}
  0x14   : > { %s2313_s18 = scalar_lea.vmem %s247_s30, 8192  ;;  %p2321_p1 = scmp.lt.s32.totalorder %s247_s30, %s247_s30 }
  0x15   : > { %p2314_p12 = scmp.ne.s32.totalorder %s247_s30, %s2313_s18  ;;  %p2322_p4 = scmp.lt.s32.totalorder %s2313_s18, %s2313_s18 }
  0x17   : > { %p2316_p13 = pnand %p2314_p12, %p2302_p7  ;;  %p2323_p3 = por %p2322_p4, %p2321_p1 }
  0x19   : > { %p2317_p0 = pneg %p2316_p13 }
  0x1b   : > { %p2324_p2 = pnand %p2323_p3, %p2317_p0 }
  0x1d   : > { %2327 = shalt.err (!%p2324_p2)
}
  0x1e   : > { %s2341_s19 = smov 256   ;;  %s2342_s20 = smov 16  }
  0x1f   : > { %2242 = dma.hbm_to_vmem [thread:$0]  (!%p2417_p5), %s2868_s4, 8192, %s247_s30, [#allocation3], %s2341_s19, %s2341_s19, %s2342_s20  }
  0x20   : > { %p2877_p6 = scmp.ne.s32.totalorder %s2875_s9, 0 }
  0x21   : > { %p2878_p8 = scmp.eq.s32.totalorder (!%p2877_p6), %s2404_s28, 0 }
  0x22   : > { %285 = sbr.rel (%p2877_p6) target bundleno = 2179 (0x883), region = 52 }
  0x29   : > { %2333 = dma.done.wait (%p2878_p8), [#allocation3], 8192   ;;  %p2879_p7 = pmov %p2878_p8 }
  0x2a   : > { %p322_p2 = scmp.lt.s32.totalorder %s2404_s28, 1  ;;  %vm358_vm0 = vcmask 1043456   ;;  %vm345_vm1 = vcmask 31744   ;;  %v341_v2 = vld [vmem:[%s2867_s3] sm:$0xff]  ;;  %v342_v4 = vld [vmem:[%s2867_s3 + $0x8] sm:$0xff]  ;;  %v343_v6 = vld [vmem:[%s2867_s3 + $0x10] sm:$0xff] }
  0x2b   : > { %2335 = vsyncadd (%p2879_p7), [#allocation3], 4294959104  ;;  %v337_v3 = vld [vmem:[%s2866_s2] sm:$0xff]  ;;  %v338_v5 = vld [vmem:[%s2866_s2 + $0x8] sm:$0xff]  ;;  %2083 = vmatprep.mubr.msk.f32.mxu1 %vm345_vm1, %v341_v2  ;;  %v2343_v37 = vmov 0.0   ;;  %v2344_v39 = vmov 0  }
  0x2c   : > { %s2881_s28 = smov (!%p322_p2, %s2404_s28), 1  ;;  %v339_v7 = vld [vmem:[%s2866_s2 + $0x10] sm:$0xff]  ;;  %2091 = vmatprep.mubr.msk.f32.mxu0 %vm345_vm1, %v337_v3  ;;  %v344_v8 = vld [vmem:[%s2867_s3 + $0x18] sm:$0xff]  ;;  %v565_v10 = vld [vmem:[#allocation2 + $0x88] sm:$0xff]  ;;  %2266 = vset.pattern.permute.xlu0 %v2344_v39  ;;  %vm580_vm2 = vcmask 523264   ;;  %s2345_s30 = smov 16  }
  0x2d   : > { %s2032_s23 = sshll.u32 %s2881_s28, 2  ;;  %v340_v9 = vld [vmem:[%s2866_s2 + $0x18] sm:$0xff]  ;;  %v564_v13 = vld [vmem:[#allocation2 + $0x80] sm:$0xff]  ;;  %v566_v14 = vld [vmem:[#allocation2 + $0x90] sm:$0xff]  ;;  %2267 = vset.pattern.permute.xlu1 %v2344_v39  ;;  %s2347_s10 = smov 15   ;;  %vm957_vm3 = vcmask 130048  }
  0x2e   : > { %s329_s26 = scalar_lea.vmem %s2865_s1, %s2032_s23  ;;  %s325_s9 = scalar_lea.vmem %s2864_s0, %s2032_s23  ;;  %v567_v11 = vld [vmem:[#allocation2 + $0x98] sm:$0xff]  ;;  %v569_v15 = vld [vmem:[#allocation2 + $0xa8] sm:$0xff]  ;;  %v2099_v16 = vpack.c.bf16 %v566_v14, %v564_v13  ;;  %v568_v18 = vld [vmem:[#allocation2 + $0xa0] sm:$0xff]  ;;  %vm982_vm4 = vcmask 121856   ;;  %vm933_vm5 = vcmask 138240   ;;  %vm1007_vm6 = vcmask 7168  }
  0x2f   : > { %v336_v0 = vld [vmem:[%s329_s26] sm:$0xf]  ;;  %v2097_v12 = vpack.c.bf16 %v567_v11, %v565_v10  ;;  %v571_v17 = vld [vmem:[#allocation2 + $0xb8] sm:$0xff]  ;;  %v570_v19 = vld [vmem:[#allocation2 + $0xb0] sm:$0xff]  ;;  %s2348_s11 = smov 127   ;;  %s2349_s12 = smov 1  }
  0x30   : > { %v335_v1 = vld [vmem:[%s325_s9] sm:$0xf]  ;;  %2081 = vmatprep.subr.msk.mxu1 %vm358_vm0, %v336_v0  ;;  %v2101_v20 = vpack.c.bf16 %v571_v17, %v569_v15  ;;  %v573_v21 = vld [vmem:[#allocation2 + $0xc8] sm:$0xff]  ;;  %v575_v22 = vld [vmem:[#allocation2 + $0xd8] sm:$0xff]  ;;  %v2103_v23 = vpack.c.bf16 %v570_v19, %v568_v18  ;;  %s2346_s9 = smov 17   ;;  %s2350_s13 = smov 113  }
  0x31   : > { %2089 = vmatprep.subr.msk.mxu0 %vm358_vm0, %v335_v1  ;;  %2082 = vmatpush3.msk.msra.mxu1 %vm358_vm0, %v336_v0  ;;  %v2105_v24 = vpack.c.bf16 %v575_v22, %v573_v21  ;;  %v572_v25 = vld [vmem:[#allocation2 + $0xc0] sm:$0xff]  ;;  %v574_v26 = vld [vmem:[#allocation2 + $0xd0] sm:$0xff]  ;;  %v577_v27 = vld [vmem:[#allocation2 + $0xe8] sm:$0xff]  ;;  %s2351_s14 = smov 112   ;;  %s2352_s15 = smov 111   ;;  %vm1031_vm7 = vcmask 1039360  }
  0x32   : > { %2090 = vmatpush3.msk.msra.mxu0 %vm358_vm0, %v335_v1  ;;  %2084 = vmatmul.mubr.msk.f32.vlgmr.msra.gmra.mrb[0].mxu1 %vm345_vm1, %v342_v4  ;;  %v579_v28 = vld [vmem:[#allocation2 + $0xf8] sm:$0xff]  ;;  %v2107_v29 = vpack.c.bf16 %v574_v26, %v572_v25  ;;  %v576_v31 = vld [vmem:[#allocation2 + $0xe0] sm:$0xff]  ;;  %v578_v32 = vld [vmem:[#allocation2 + $0xf0] sm:$0xff]  ;;  %vm1056_vm8 = vcmask 924672   ;;  %vm1081_vm9 = vcmask 916480   ;;  %vm1106_vm10 = vcmask 908288  }
  0x33   : > { %2092 = vmatmul.mubr.msk.f32.vlgmr.msra.gmra.mrb[0].mxu0 %vm345_vm1, %v338_v5  ;;  %2086 = vmatprep.mubr.msk.f32.mxu1 %vm345_vm1, %v343_v6  ;;  %v2109_v30 = vpack.c.bf16 %v579_v28, %v577_v27  ;;  %v2111_v33 = vpack.c.bf16 %v578_v32, %v576_v31  ;;  %v548_v34 = vld [vmem:[#allocation2 + $0x8] sm:$0xff]  ;;  %v550_v35 = vld [vmem:[#allocation2 + $0x18] sm:$0xff]  ;;  %v915_v38 = vld [vmem:[%s2870_s6] sm:$0xff]  ;;  %vm1132_vm11 = vcmask 588800  }
  0x34   : > { %2094 = vmatprep.mubr.msk.f32.mxu0 %vm345_vm1, %v339_v7  ;;  %2098 = vmatprep.subr.bf16.mxu1 %v2097_v12  ;;  %v2113_v36 = vpack.c.bf16 %v550_v35, %v548_v34  ;;  %v547_v40 = vld [vmem:[#allocation2] sm:$0xff]  ;;  %v549_v41 = vld [vmem:[#allocation2 + $0x10] sm:$0xff]  ;;  %v552_v42 = vld [vmem:[#allocation2 + $0x28] sm:$0xff] }
  0x35   : > { %2100 = vmatpush1.bf16.msra.mxu1 %v2099_v16  ;;  %918 = vperm.xlu0 %2266, %v915_v38   ;;  %v554_v43 = vld [vmem:[#allocation2 + $0x38] sm:$0xff]  ;;  %v2115_v46 = vpack.c.bf16 %v549_v41, %v547_v40  ;;  %v551_v51 = vld [vmem:[#allocation2 + $0x20] sm:$0xff]  ;;  %v553_v52 = vld [vmem:[#allocation2 + $0x30] sm:$0xff] }
  0x36   : > { %2087 = vmatmul.mubr.msk.f32.gmra.mrb[2].mxu1 %vm345_vm1, %v344_v8  ;;  %2102 = vmatprep.subr.bf16.mxu1 %v2101_v20  ;;  %v2117_v50 = vpack.c.bf16 %v554_v43, %v552_v42  ;;  %v556_v54 = vld [vmem:[#allocation2 + $0x48] sm:$0xff]  ;;  %v558_v55 = vld [vmem:[#allocation2 + $0x58] sm:$0xff]  ;;  %v2119_v56 = vpack.c.bf16 %v553_v52, %v551_v51  ;;  %v555_v60 = vld [vmem:[#allocation2 + $0x40] sm:$0xff] }
  0x37   : > { %2095 = vmatmul.mubr.msk.f32.gmra.mrb[2].mxu0 %vm345_vm1, %v340_v9  ;;  %648 = vmatprep.mubr.f32.mxu1 %v2343_v37  ;;  %v2121_v59 = vpack.c.bf16 %v558_v55, %v556_v54  ;;  %v557_v61 = vld [vmem:[#allocation2 + $0x50] sm:$0xff]  ;;  %v560_v1 = vld [vmem:[#allocation2 + $0x68] sm:$0xff]  ;;  %v562_v2 = vld [vmem:[#allocation2 + $0x78] sm:$0xff] }
  0x38   : > { %1200 = vmatprep.mubr.f32.mxu0 %v2343_v37  ;;  %v2123_v4 = vpack.c.bf16 %v557_v61, %v555_v60  ;;  %v2125_v5 = vpack.c.bf16 %v562_v2, %v560_v1  ;;  %v559_v6 = vld [vmem:[#allocation2 + $0x60] sm:$0xff]  ;;  %v561_v7 = vld [vmem:[#allocation2 + $0x70] sm:$0xff]  ;;  %v731_v8 = vld [vmem:[#allocation2 + $0x108] sm:$0xff] }
  0x39   : > { %2104 = vmatpush1.bf16.msra.mxu1 %v2103_v23  ;;  %v733_v9 = vld [vmem:[#allocation2 + $0x118] sm:$0xff]  ;;  %v2127_v10 = vpack.c.bf16 %v561_v7, %v559_v6  ;;  %v730_v12 = vld [vmem:[#allocation2 + $0x100] sm:$0xff]  ;;  %v732_v13 = vld [vmem:[#allocation2 + $0x110] sm:$0xff] }
  0x3a   : > { %2106 = vmatprep.subr.bf16.mxu1 %v2105_v24  ;;  %v2129_v11 = vpack.c.bf16 %v733_v9, %v731_v8  ;;  %v735_v14 = vld [vmem:[#allocation2 + $0x128] sm:$0xff]  ;;  %v737_v15 = vld [vmem:[#allocation2 + $0x138] sm:$0xff]  ;;  %v2131_v16 = vpack.c.bf16 %v732_v13, %v730_v12  ;;  %v734_v18 = vld [vmem:[#allocation2 + $0x120] sm:$0xff] }
  0x3b   : > { %v2133_v17 = vpack.c.bf16 %v737_v15, %v735_v14  ;;  %v736_v19 = vld [vmem:[#allocation2 + $0x130] sm:$0xff]  ;;  %v739_v20 = vld [vmem:[#allocation2 + $0x148] sm:$0xff]  ;;  %v741_v21 = vld [vmem:[#allocation2 + $0x158] sm:$0xff] }
  0x3c   : > { %v2135_v22 = vpack.c.bf16 %v736_v19, %v734_v18  ;;  %v2137_v23 = vpack.c.bf16 %v741_v21, %v739_v20  ;;  %v738_v24 = vld [vmem:[#allocation2 + $0x140] sm:$0xff]  ;;  %v740_v25 = vld [vmem:[#allocation2 + $0x150] sm:$0xff]  ;;  %v743_v26 = vld [vmem:[#allocation2 + $0x168] sm:$0xff] }
  0x3d   : > { %2108 = vmatpush1.bf16.msra.mxu1 %v2107_v29  ;;  %v745_v27 = vld [vmem:[#allocation2 + $0x178] sm:$0xff]  ;;  %v2139_v28 = vpack.c.bf16 %v740_v25, %v738_v24  ;;  %v744_v31 = vld [vmem:[#allocation2 + $0x170] sm:$0xff]  ;;  %v824_v32 = vld [vmem:[#allocation2 + $0x188] sm:$0xff] }
  0x3e   : > { %2110 = vmatprep.subr.bf16.mxu1 %v2109_v30  ;;  %v2141_v29 = vpack.c.bf16 %v745_v27, %v743_v26  ;;  %v742_v30 = vld [vmem:[#allocation2 + $0x160] sm:$0xff]  ;;  %v825_v38 = vld [vmem:[#allocation2 + $0x190] sm:$0xff]  ;;  %v828_v39 = vld [vmem:[#allocation2 + $0x1a8] sm:$0xff] }
  0x3f   : > { %v2143_v34 = vpack.c.bf16 %v744_v31, %v742_v30  ;;  %v830_v40 = vld [vmem:[#allocation2 + $0x1b8] sm:$0xff]  ;;  %v827_v43 = vld [vmem:[#allocation2 + $0x1a0] sm:$0xff]  ;;  %v836_v51 = vld [vmem:[#allocation2 + $0x1e8] sm:$0xff] }
  0x40   : > { %v2149_v42 = vpack.c.bf16 %v830_v40, %v828_v39  ;;  %v838_v52 = vld [vmem:[#allocation2 + $0x1f8] sm:$0xff]  ;;  %v835_v55 = vld [vmem:[#allocation2 + $0x1e0] sm:$0xff] }
  0x41   : > { %2112 = vmatpush1.bf16.msra.mxu1 %v2111_v33  ;;  %v826_v33 = vld [vmem:[#allocation2 + $0x198] sm:$0xff]  ;;  %v2157_v54 = vpack.c.bf16 %v838_v52, %v836_v51  ;;  %v2051_v8 = vld [vmem:[%s2871_s7 + $0x2] sm:$0x3]  ;;  %v938_v9 = vld [vmem:[%s2871_s7] sm:$0x3] }
  0x42   : > { %2114 = vmatprep.subr.bf16.mxu1 %v2113_v36  ;;  %v2145_v35 = vpack.c.bf16 %v826_v33, %v824_v32  ;;  %v823_v36 = vld [vmem:[#allocation2 + $0x180] sm:$0xff]  ;;  %v2055_v51 = vld [vmem:[%s2871_s7 + $0xc] sm:$0x3]  ;;  %v2056_v52 = vld [vmem:[%s2871_s7 + $0xe] sm:$0x3] }
  0x43   : > { %v2147_v41 = vpack.c.bf16 %v825_v38, %v823_v36  ;;  %v2052_v12 = vld [vmem:[%s2871_s7 + $0x4] sm:$0x3]  ;;  %v2053_v15 = vld [vmem:[%s2871_s7 + $0x6] sm:$0x3] }
 0x105   : > { %v2085_v44 = vpop.f32.mrb[0].mxu1 }
 0x106   : > { %v2093_v45 = vpop.f32.mrb[0].mxu0  ;;  %v428_v48 = vpop.f32.mrb[1].mxu1 }
 0x107   : > { %v534_v47 = vadd.f32 %v2093_v45, %v2085_v44  ;;  %v528_v49 = vpop.f32.mrb[1].mxu0  ;;  %v829_v44 = vld [vmem:[#allocation2 + $0x1b0] sm:$0xff]  ;;  %v832_v45 = vld [vmem:[#allocation2 + $0x1c8] sm:$0xff] }
 0x108   : > { %v529_v53 = vadd.f32 %v528_v49, %v428_v48  ;;  %v831_v49 = vld [vmem:[#allocation2 + $0x1c0] sm:$0xff] }
 0x109   : > { %2046 = vmatmul.mubr.msk.f32.vlgmr.msra.gmra.mrb[4].mxu1 %vm580_vm2, %v534_v47  ;;  %v2088_v57 = vpop.f32.mrb[2].mxu1  ;;  %v2151_v47 = vpack.c.bf16 %v829_v44, %v827_v43 }
 0x10a   : > { %2116 = vmatpush1.bf16.msra.mxu1 %v2115_v46  ;;  %722 = vmatprep.mubr.f32.mxu1 %v2343_v37  ;;  %v2096_v58 = vpop.f32.mrb[2].mxu0  ;;  %v438_v63 = vpop.f32.mrb[3].mxu1  ;;  %v834_v46 = vld [vmem:[#allocation2 + $0x1d8] sm:$0xff] }
 0x10b   : > { %2118 = vmatprep.subr.bf16.mxu1 %v2117_v50  ;;  %v2493_v62 = vadd.f32 %v2096_v58, %v2088_v57  ;;  %v538_v0 = vpop.f32.mrb[3].mxu0  ;;  %v2153_v48 = vpack.c.bf16 %v834_v46, %v832_v45  ;;  %v833_v50 = vld [vmem:[#allocation2 + $0x1d0] sm:$0xff]  ;;  %v919_v58 = vpop.permute.xlu0 %918 }
 0x10c   : > { %v539_v3 = vadd.f32 %v538_v0, %v438_v63  ;;  %v2050_v63 = vld [vmem:[%s2870_s6 + $0x8] sm:$0xff]  ;;  %v940_v0 = vlaneseq }
 0x10e   : > { %2120 = vmatpush1.bf16.msra.mxu1 %v2119_v56  ;;  %v837_v56 = vld [vmem:[#allocation2 + $0x1f0] sm:$0xff] }
 0x10f   : > { %2122 = vmatprep.subr.bf16.mxu1 %v2121_v59  ;;  %v2159_v57 = vpack.c.bf16 %v837_v56, %v835_v55 }
 0x112   : > { %2124 = vmatpush1.bf16.msra.mxu1 %v2123_v4 }
 0x113   : > { %2126 = vmatprep.subr.bf16.mxu1 %v2125_v5 }
 0x116   : > { %2128 = vmatpush1.bf16.msra.mxu1 %v2127_v10 }
 0x117   : > { %2130 = vmatprep.subr.bf16.mxu1 %v2129_v11 }
 0x119   : > { %2047 = vmatmul.mubr.msk.f32.vlgmr.msra.gmra.mrb[4].mxu1 %vm580_vm2, %v529_v53  ;;  %v2155_v53 = vpack.c.bf16 %v833_v50, %v831_v49 }
 0x11a   : > { %2132 = vmatpush1.bf16.msra.mxu1 %v2131_v16  ;;  %813 = vmatprep.mubr.f32.mxu1 %v2343_v37  ;;  %v2054_v16 = vld [vmem:[%s2871_s7 + $0xa] sm:$0x3] }
 0x11b   : > { %2134 = vmatprep.subr.bf16.mxu1 %v2133_v17 }
 0x11e   : > { %2136 = vmatpush1.bf16.msra.mxu1 %v2135_v22 }
 0x11f   : > { %2138 = vmatprep.subr.bf16.mxu1 %v2137_v23 }
 0x122   : > { %2140 = vmatpush1.bf16.msra.mxu1 %v2139_v28 }
 0x123   : > { %2142 = vmatprep.subr.bf16.mxu1 %v2141_v29 }
 0x126   : > { %2144 = vmatpush1.bf16.msra.mxu1 %v2143_v34 }
 0x127   : > { %2146 = vmatprep.subr.bf16.mxu1 %v2145_v35 }
 0x129   : > { %2048 = vmatmul.mubr.msk.f32.vlgmr.msra.gmra.mrb[4].mxu1 %vm580_vm2, %v539_v3  ;;  %v941_v3 = vshrl.u32 %v940_v0, 7 }
 0x12a   : > { %2148 = vmatpush1.bf16.msra.mxu1 %v2147_v41  ;;  %906 = vmatprep.mubr.f32.mxu1 %v2343_v37 }
 0x12b   : > { %2150 = vmatprep.subr.bf16.mxu1 %v2149_v42  ;;  %v2540_v6 = vsub.s32 0, %v941_v3  ;;  %v2542_v7 = vsub.s32 1, %v941_v3 }
 0x12d   : > { %v2554_v13 = vrot.slane %v2051_v8, %v2540_v6  ;;  %v2557_v14 = vrot.slane %v2051_v8, %v2542_v7  ;;  %v2567_v18 = vrot.slane %v938_v9, %v2540_v6  ;;  %v2570_v19 = vrot.slane %v938_v9, %v2542_v7 }
 0x12e   : > { %2152 = vmatpush1.bf16.msra.mxu1 %v2151_v47  ;;  %v2574_v21 = vrot.slane %v2052_v12, %v2540_v6  ;;  %v2577_v22 = vrot.slane %v2052_v12, %v2542_v7  ;;  %v2580_v25 = vrot.slane %v2053_v15, %v2540_v6  ;;  %v2583_v26 = vrot.slane %v2053_v15, %v2542_v7 }
 0x12f   : > { %2154 = vmatprep.subr.bf16.mxu1 %v2153_v48  ;;  %v2586_v27 = vrot.slane %v2054_v16, %v2542_v7  ;;  %v2598_v40 = vrot.slane %v2054_v16, %v2540_v6  ;;  %v2626_v0 = vrot.slane %v2056_v52, %v2542_v7 }
 0x132   : > { %2156 = vmatpush1.bf16.msra.mxu1 %v2155_v53 }
 0x133   : > { %2158 = vmatprep.subr.bf16.mxu1 %v2157_v54 }
 0x136   : > { %2160 = vmatpush1.bf16.msra.mxu1 %v2159_v57 }
 0x139   : > { %2049 = vmatmul.mubr.msk.f32.vlgmr.msra.gmra.mrb[4].mxu1 %vm580_vm2, %v2493_v62 }
 0x20c   : > { %v908_v59 = vpop.f32.mrb[4].mxu1 }
 0x20d   : > { %v2501_v60 = vadd.f32 %v919_v58, %v908_v59  ;;  %v910_v61 = vpop.f32.mrb[5].mxu1  ;;  %v2619_v59 = vrot.slane %v2055_v51, %v2542_v7 }
 0x20e   : > { %v2511_v62 = vadd.f32 %v919_v58, %v910_v61  ;;  %v2616_v58 = vrot.slane %v2055_v51, %v2540_v6 }
 0x20f   : > { %955 = vrot.lane.b32.xlu0 %v2501_v60, %s2345_s30  ;;  %931 = vrot.lane.b32.xlu1 %v2501_v60, %s2346_s9 }
 0x213   : > { %980 = vrot.lane.b32.xlu0 %v2501_v60, %s2347_s10  ;;  %1027 = vrot.lane.b32.xlu1 %v2501_v60, %s2348_s11 }
 0x217   : > { %1005 = vrot.lane.b32.xlu0 %v2501_v60, %s2349_s12  ;;  %952 = vrot.lane.b32.xlu1 %v2511_v62, %s2345_s30 }
 0x21b   : > { %977 = vrot.lane.b32.xlu1 %v2511_v62, %s2347_s10  ;;  %927 = vrot.lane.b32.xlu0 %v2511_v62, %s2346_s9 }
 0x21f   : > { %1002 = vrot.lane.b32.xlu1 %v2511_v62, %s2349_s12  ;;  %1029 = vrot.lane.b32.xlu0 %v2511_v62, %s2348_s11 }
 0x223   : > { %1052 = vrot.lane.b32.xlu1 %v2501_v60, %s2350_s13  ;;  %1054 = vrot.lane.b32.xlu0 %v2511_v62, %s2350_s13 }
 0x227   : > { %1077 = vrot.lane.b32.xlu1 %v2501_v60, %s2351_s14  ;;  %1079 = vrot.lane.b32.xlu0 %v2511_v62, %s2351_s14 }
 0x22b   : > { %1102 = vrot.lane.b32.xlu1 %v2501_v60, %s2352_s15  ;;  %1104 = vrot.lane.b32.xlu0 %v2511_v62, %s2352_s15 }
 0x22f   : > { %1129 = vperm.xlu1 %2267, %v2050_v63   ;;  %v2623_v63 = vrot.slane %v2056_v52, %v2540_v6 }
 0x281   : > { %v956_v1 = vpop.permute.xlu0 %955  ;;  %v932_v2 = vpop.permute.xlu1 %931 }
 0x285   : > { %v981_v4 = vpop.permute.xlu0 %980  ;;  %v1028_v5 = vpop.permute.xlu1 %1027 }
 0x289   : > { %v1006_v10 = vpop.permute.xlu0 %1005  ;;  %v953_v11 = vpop.permute.xlu1 %952 }
 0x28a   : > { %v961_v17 = vsel %vm957_vm3, %v953_v11, %v956_v1  ;;  %v958_v20 = vsel %vm957_vm3, %v956_v1, %v953_v11  ;;  %v2057_v1 = vld [vmem:[%s2871_s7 + $0x10] sm:$0x3] }
 0x28b   : > { %v975_v28 = vmul.f32 %v2554_v13, %v961_v17  ;;  %v976_v32 = vmul.f32 %v2557_v14, %v958_v20  ;;  %v2637_v11 = vrot.slane %v2057_v1, %v2542_v7 }
 0x28d   : > { %v978_v23 = vpop.permute.xlu1 %977  ;;  %v928_v24 = vpop.permute.xlu0 %927 }
 0x28e   : > { %v986_v29 = vsel %vm982_vm4, %v978_v23, %v981_v4  ;;  %v934_v30 = vsel %vm933_vm5, %v932_v2, %v928_v24  ;;  %v937_v31 = vsel %vm933_vm5, %v928_v24, %v932_v2  ;;  %v983_v33 = vsel %vm982_vm4, %v981_v4, %v978_v23 }
 0x28f   : > { %v950_v34 = vmul.f32 %v2567_v18, %v937_v31  ;;  %v951_v35 = vmul.f32 %v2570_v19, %v934_v30  ;;  %v1000_v36 = vmul.f32 %v2574_v21, %v986_v29  ;;  %v1001_v43 = vmul.f32 %v2577_v22, %v983_v33  ;;  %v923_v33 = vld [vmem:[%s2869_s5] sm:$0xff] }
 0x290   : > { %v2644_v29 = vrot.slane %v2057_v1, %v2540_v6 }
 0x291   : > { %v2163_v38 = vpack.c.bf16 %v975_v28, %v950_v34  ;;  %v1003_v39 = vpop.permute.xlu1 %1002  ;;  %v1030_v41 = vpop.permute.xlu0 %1029  ;;  %v2161_v42 = vpack.c.bf16 %v976_v32, %v951_v35 }
 0x292   : > { %v1008_v44 = vsel %vm1007_vm6, %v1006_v10, %v1003_v39  ;;  %v1011_v45 = vsel %vm1007_vm6, %v1003_v39, %v1006_v10  ;;  %v1036_v46 = vsel %vm1031_vm7, %v1030_v41, %v1028_v5  ;;  %v1032_v49 = vsel %vm1031_vm7, %v1028_v5, %v1030_v41 }
 0x293   : > { %v1025_v47 = vmul.f32 %v2580_v25, %v1011_v45  ;;  %v1026_v48 = vmul.f32 %v2583_v26, %v1008_v44  ;;  %v1051_v50 = vmul.f32 %v2586_v27, %v1036_v46  ;;  %2162 = vmatprep.subr.bf16.mxu0 %v2161_v42  ;;  %v1050_v57 = vmul.f32 %v2598_v40, %v1032_v49 }
 0x294   : > { %2164 = vmatpush1.bf16.msra.mxu0 %v2163_v38 }
 0x295   : > { %v2167_v53 = vpack.c.bf16 %v1025_v47, %v1000_v36  ;;  %v1053_v54 = vpop.permute.xlu1 %1052  ;;  %v1055_v55 = vpop.permute.xlu0 %1054  ;;  %v2165_v56 = vpack.c.bf16 %v1026_v48, %v1001_v43  ;;  %v2169_v61 = vpack.c.bf16 %v1051_v50, %v2511_v62  ;;  %v2171_v8 = vpack.c.bf16 %v1050_v57, %v2501_v60 }
 0x296   : > { %v1057_v2 = vsel %vm1056_vm8, %v1053_v54, %v1055_v55  ;;  %v1061_v3 = vsel %vm1056_vm8, %v1055_v55, %v1053_v54 }
 0x297   : > { %2166 = vmatprep.subr.bf16.mxu0 %v2165_v56  ;;  %v1075_v12 = vmul.f32 %v2616_v58, %v1057_v2  ;;  %v1076_v15 = vmul.f32 %v2619_v59, %v1061_v3 }
 0x298   : > { %2168 = vmatpush1.bf16.msra.mxu0 %v2167_v53 }
 0x299   : > { %v1078_v4 = vpop.permute.xlu1 %1077  ;;  %2170 = vmatprep.subr.bf16.mxu0 %v2169_v61  ;;  %v1080_v5 = vpop.permute.xlu0 %1079 }
 0x29a   : > { %v1082_v9 = vsel %vm1081_vm9, %v1078_v4, %v1080_v5  ;;  %v1086_v10 = vsel %vm1081_vm9, %v1080_v5, %v1078_v4 }
 0x29b   : > { %v1100_v16 = vmul.f32 %v2623_v63, %v1082_v9  ;;  %v1101_v17 = vmul.f32 %v2626_v0, %v1086_v10 }
 0x29c   : > { %2172 = vmatpush1.bf16.msra.mxu0 %v2171_v8 }
 0x29d   : > { %v2175_v20 = vpack.c.bf16 %v1100_v16, %v1075_v12  ;;  %v1103_v23 = vpop.permute.xlu1 %1102  ;;  %v1105_v24 = vpop.permute.xlu0 %1104  ;;  %v2173_v28 = vpack.c.bf16 %v1101_v17, %v1076_v15 }
 0x29e   : > { %v1111_v30 = vsel %vm1106_vm10, %v1105_v24, %v1103_v23  ;;  %v1107_v7 = vsel %vm1106_vm10, %v1103_v23, %v1105_v24 }
 0x29f   : > { %v1126_v31 = vmul.f32 %v2637_v11, %v1111_v30  ;;  %2174 = vmatprep.subr.bf16.mxu0 %v2173_v28  ;;  %v1125_v32 = vmul.f32 %v2644_v29, %v1107_v7 }
 0x2a0   : > { %2176 = vmatpush1.bf16.msra.mxu0 %v2175_v20 }
 0x2a1   : > { %1152 = vmatprep.subr.mxu0 %v1126_v31 }
 0x2a4   : > { %1153 = vmatpush1.msra.mxu0 %v1125_v32 }
 0x2a5   : > { %2058 = vmatmul.mubr.msk.f32.vlgmr.msra.gmra.mrb[4].mxu0 %vm1132_vm11, %v923_v33 }
 0x2a6   : > { %1427 = vmatprep.mubr.f32.mxu0 %v2343_v37 }
 0x2ae   : > { %v1130_v6 = vpop.permute.xlu1 %1129 }
 0x378   : > { %v1202_v34 = vpop.f32.mrb[4].mxu0 }
 0x379   : > { %v1203_v35 = vadd.f32 %v1202_v34, %v1130_v6  ;;  %v1204_v36 = vpop.f32.mrb[5].mxu0 }
 0x37a   : > { %v1205_v38 = vadd.f32 %v1204_v36, %v1130_v6 }
 0x37b   : > { %v1209_v39 = vmul.f32 0.70710677, %v1203_v35 }
 0x37c   : > { %v1210_v41 = vmul.f32 0.70710677, %v1205_v38 }
 0x37d   : > { %v1211_v42 = vand.u32 2147483647, %v1209_v39  ;;  %vm1251_vm12 = vcmp.lt.f32.partialorder %v1209_v39, 0.0 }
 0x37e   : > { %v1212_v43 = vand.u32 2147483647, %v1210_v41  ;;  %vm1252_vm13 = vcmp.lt.f32.partialorder %v1210_v41, 0.0 }
 0x37f   : > { %v1213_v44 = vmul.f32 0.3275911, %v1211_v42  ;;  %v1239_v48 = vsub.f32 0.0, %v1211_v42 }
 0x380   : > { %v1214_v45 = vmul.f32 0.3275911, %v1212_v43  ;;  %v1240_v49 = vsub.f32 0.0, %v1212_v43 }
 0x381   : > { %v1215_v46 = vadd.f32 1.0, %v1213_v44  ;;  %v1241_v51 = vmul.f32 %v1239_v48, %v1211_v42  ;;  %v1207_v42 = vmul.f32 0.5, %v1203_v35  ;;  %v2060_v35 = vld [vmem:[%s2870_s6 + $0x10] sm:$0xff] }
 0x382   : > { %v1216_v47 = vadd.f32 1.0, %v1214_v45  ;;  %v1242_v54 = vmul.f32 %v1240_v49, %v1212_v43 }
 0x383   : > { %2268 = vrcp.f32 %v1215_v46  ;;  %v1243_v57 = vmul.f32 1.442695, %v1241_v51 }
 0x384   : > { %2270 = vrcp.f32 %v1216_v47  ;;  %v1245_v2 = vmul.f32 1.442695, %v1242_v54  ;;  %v1208_v47 = vmul.f32 0.5, %v1205_v38 }
 0x385   : > { %2272 = vpow2.f32 %v1243_v57 }
 0x386   : > { %2274 = vpow2.f32 %v1245_v2 }
 0x38d   : > { %v2269_v50 = vpop.eup %2268 }
 0x38e   : > { %v2271_v52 = vpop.eup %2270  ;;  %v1221_v53 = vmul.f32 1.0614054, %v2269_v50 }
 0x38f   : > { %v1222_v55 = vmul.f32 1.0614054, %v2271_v52  ;;  %v2273_v24 = vpop.eup %2272 }
 0x390   : > { %v1223_v56 = vadd.f32 -1.4531521, %v1221_v53  ;;  %v2275_v30 = vpop.eup %2274 }
 0x391   : > { %v1224_v61 = vadd.f32 -1.4531521, %v1222_v55 }
 0x392   : > { %v1225_v1 = vmul.f32 %v2269_v50, %v1223_v56 }
 0x393   : > { %v1226_v3 = vmul.f32 %v2271_v52, %v1224_v61 }
 0x394   : > { %v1227_v4 = vadd.f32 1.4214138, %v1225_v1 }
 0x395   : > { %v1228_v5 = vadd.f32 1.4214138, %v1226_v3 }
 0x396   : > { %v1229_v8 = vmul.f32 %v2269_v50, %v1227_v4 }
 0x397   : > { %v1230_v9 = vmul.f32 %v2271_v52, %v1228_v5 }
 0x398   : > { %v1231_v10 = vadd.f32 -0.28449672, %v1229_v8 }
 0x399   : > { %v1232_v12 = vadd.f32 -0.28449672, %v1230_v9 }
 0x39a   : > { %v1233_v15 = vmul.f32 %v2269_v50, %v1231_v10 }
 0x39b   : > { %v1234_v16 = vmul.f32 %v2271_v52, %v1232_v12 }
 0x39c   : > { %v1235_v17 = vadd.f32 0.2548296, %v1233_v15 }
 0x39d   : > { %v1236_v20 = vadd.f32 0.2548296, %v1234_v16 }
 0x39e   : > { %v1237_v23 = vmul.f32 %v2269_v50, %v1235_v17 }
 0x39f   : > { %v1238_v28 = vmul.f32 %v2271_v52, %v1236_v20 }
 0x3a0   : > { %v1247_v7 = vmul.f32 %v2273_v24, %v1237_v23 }
 0x3a1   : > { %v1248_v31 = vmul.f32 %v2275_v30, %v1238_v28 }
 0x3a2   : > { %v1249_v32 = vsub.f32 1.0, %v1247_v7 }
 0x3a3   : > { %v1250_v33 = vsub.f32 1.0, %v1248_v31 }
 0x3a4   : > { %v1253_v6 = vsub.f32 0.0, %v1249_v32 }
 0x3a5   : > { %v1254_v34 = vsub.f32 0.0, %v1250_v33 }
 0x3a6   : > { %v1255_v36 = vsel %vm1251_vm12, %v1253_v6, %v1249_v32 }
 0x3a7   : > { %v1257_v43 = vadd.f32 1.0, %v1255_v36  ;;  %v1256_v44 = vsel %vm1252_vm13, %v1254_v34, %v1250_v33 }
 0x3a8   : > { %v1258_v46 = vadd.f32 1.0, %v1256_v44 }
 0x3a9   : > { %v2655_v45 = vmul.f32 %v1257_v43, %v1207_v42 }
 0x3aa   : > { %v1260_v48 = vmul.f32 %v1258_v46, %v1208_v47 }
 0x3ab   : > { %1311 = vrot.lane.b32.xlu0 %v2655_v45, %s2348_s11  ;;  %1270 = vrot.lane.b32.xlu1 %v2655_v45, %s2346_s9 }
 0x3af   : > { %1266 = vrot.lane.b32.xlu0 %v1260_v48, %s2346_s9  ;;  %1281 = vrot.lane.b32.xlu1 %v2655_v45, %s2345_s30 }
 0x3b3   : > { %1278 = vrot.lane.b32.xlu0 %v1260_v48, %s2345_s30  ;;  %1292 = vrot.lane.b32.xlu1 %v2655_v45, %s2347_s10 }
 0x3b7   : > { %1289 = vrot.lane.b32.xlu0 %v1260_v48, %s2347_s10  ;;  %1303 = vrot.lane.b32.xlu1 %v2655_v45, %s2349_s12 }
 0x3bb   : > { %1300 = vrot.lane.b32.xlu0 %v1260_v48, %s2349_s12  ;;  %1313 = vrot.lane.b32.xlu1 %v1260_v48, %s2348_s11 }
 0x3bf   : > { %1322 = vrot.lane.b32.xlu0 %v2655_v45, %s2350_s13  ;;  %1324 = vrot.lane.b32.xlu1 %v1260_v48, %s2350_s13 }
 0x3c3   : > { %1333 = vrot.lane.b32.xlu0 %v2655_v45, %s2351_s14  ;;  %1335 = vrot.lane.b32.xlu1 %v1260_v48, %s2351_s14 }
 0x3c7   : > { %1344 = vrot.lane.b32.xlu0 %v2655_v45, %s2352_s15  ;;  %1346 = vrot.lane.b32.xlu1 %v1260_v48, %s2352_s15 }
 0x3cb   : > { %1357 = vperm.xlu0 %2266, %v2060_v35  }
 0x41d   : > { %v1312_v38 = vpop.permute.xlu0 %1311  ;;  %v1271_v39 = vpop.permute.xlu1 %1270 }
 0x421   : > { %v1267_v41 = vpop.permute.xlu0 %1266  ;;  %v1282_v49 = vpop.permute.xlu1 %1281 }
 0x422   : > { %v1272_v50 = vsel %vm933_vm5, %v1271_v39, %v1267_v41  ;;  %v1275_v51 = vsel %vm933_vm5, %v1267_v41, %v1271_v39 }
 0x423   : > { %v1276_v56 = vmul.f32 %v1275_v51, %v2567_v18  ;;  %v1277_v57 = vmul.f32 %v1272_v50, %v2570_v19 }
 0x425   : > { %v1279_v52 = vpop.permute.xlu0 %1278  ;;  %v1293_v53 = vpop.permute.xlu1 %1292 }
 0x426   : > { %v1283_v54 = vsel %vm957_vm3, %v1282_v49, %v1279_v52  ;;  %v1286_v55 = vsel %vm957_vm3, %v1279_v52, %v1282_v49 }
 0x427   : > { %v1287_v61 = vmul.f32 %v1286_v55, %v2554_v13  ;;  %v1288_v1 = vmul.f32 %v1283_v54, %v2557_v14 }
 0x429   : > { %v2179_v2 = vpack.c.bf16 %v1287_v61, %v1276_v56  ;;  %v1290_v3 = vpop.permute.xlu0 %1289  ;;  %v1304_v4 = vpop.permute.xlu1 %1303  ;;  %v2177_v5 = vpack.c.bf16 %v1288_v1, %v1277_v57  ;;  %v2059_v57 = vld [vmem:[%s2869_s5 + $0x8] sm:$0xff] }
 0x42a   : > { %v1297_v8 = vsel %vm982_vm4, %v1290_v3, %v1293_v53  ;;  %v1294_v9 = vsel %vm982_vm4, %v1293_v53, %v1290_v3 }
 0x42b   : > { %2178 = vmatprep.subr.bf16.mxu0 %v2177_v5  ;;  %v1298_v10 = vmul.f32 %v1297_v8, %v2574_v21  ;;  %v1299_v16 = vmul.f32 %v1294_v9, %v2577_v22 }
 0x42c   : > { %2180 = vmatpush1.bf16.msra.mxu0 %v2179_v2 }
 0x42d   : > { %v1301_v12 = vpop.permute.xlu0 %1300  ;;  %v1314_v15 = vpop.permute.xlu1 %1313 }
 0x42e   : > { %v1305_v17 = vsel %vm1007_vm6, %v1304_v4, %v1301_v12  ;;  %v1308_v20 = vsel %vm1007_vm6, %v1301_v12, %v1304_v4  ;;  %v1319_v23 = vsel %vm1031_vm7, %v1314_v15, %v1312_v38  ;;  %v1315_v30 = vsel %vm1031_vm7, %v1312_v38, %v1314_v15 }
 0x42f   : > { %v1309_v24 = vmul.f32 %v1308_v20, %v2580_v25  ;;  %v1310_v28 = vmul.f32 %v1305_v17, %v2583_v26  ;;  %v1321_v7 = vmul.f32 %v1319_v23, %v2586_v27  ;;  %v1320_v34 = vmul.f32 %v1315_v30, %v2598_v40 }
 0x431   : > { %v2183_v31 = vpack.c.bf16 %v1309_v24, %v1298_v10  ;;  %v1323_v32 = vpop.permute.xlu0 %1322  ;;  %v1325_v33 = vpop.permute.xlu1 %1324  ;;  %v2181_v6 = vpack.c.bf16 %v1310_v28, %v1299_v16  ;;  %v2185_v36 = vpack.c.bf16 %v1321_v7, %v1260_v48  ;;  %v2187_v47 = vpack.c.bf16 %v1320_v34, %v2655_v45 }
 0x432   : > { %v1326_v42 = vsel %vm1056_vm8, %v1323_v32, %v1325_v33  ;;  %v1330_v43 = vsel %vm1056_vm8, %v1325_v33, %v1323_v32 }
 0x433   : > { %2182 = vmatprep.subr.bf16.mxu0 %v2181_v6  ;;  %v1331_v39 = vmul.f32 %v1326_v42, %v2616_v58  ;;  %v1332_v41 = vmul.f32 %v1330_v43, %v2619_v59 }
 0x434   : > { %2184 = vmatpush1.bf16.msra.mxu0 %v2183_v31 }
 0x435   : > { %v1334_v44 = vpop.permute.xlu0 %1333  ;;  %2186 = vmatprep.subr.bf16.mxu0 %v2185_v36  ;;  %v1336_v46 = vpop.permute.xlu1 %1335 }
 0x436   : > { %v1337_v35 = vsel %vm1081_vm9, %v1334_v44, %v1336_v46  ;;  %v1341_v38 = vsel %vm1081_vm9, %v1336_v46, %v1334_v44 }
 0x437   : > { %v1342_v48 = vmul.f32 %v1337_v35, %v2623_v63  ;;  %v1343_v49 = vmul.f32 %v1341_v38, %v2626_v0 }
 0x438   : > { %2188 = vmatpush1.bf16.msra.mxu0 %v2187_v47 }
 0x439   : > { %v2191_v50 = vpack.c.bf16 %v1342_v48, %v1331_v39  ;;  %v1345_v51 = vpop.permute.xlu0 %1344  ;;  %v1347_v52 = vpop.permute.xlu1 %1346  ;;  %v2189_v53 = vpack.c.bf16 %v1343_v49, %v1332_v41 }
 0x43a   : > { %v1352_v54 = vsel %vm1106_vm10, %v1347_v52, %v1345_v51  ;;  %v1348_v45 = vsel %vm1106_vm10, %v1345_v51, %v1347_v52 }
 0x43b   : > { %v1354_v55 = vmul.f32 %v1352_v54, %v2637_v11  ;;  %2190 = vmatprep.subr.bf16.mxu0 %v2189_v53  ;;  %v1353_v56 = vmul.f32 %v1348_v45, %v2644_v29 }
 0x43c   : > { %2192 = vmatpush1.bf16.msra.mxu0 %v2191_v50 }
 0x43d   : > { %1379 = vmatprep.subr.mxu0 %v1354_v55 }
 0x440   : > { %1380 = vmatpush1.msra.mxu0 %v1353_v56 }
 0x441   : > { %2061 = vmatmul.mubr.msk.f32.vlgmr.msra.gmra.mrb[6].mxu0 %vm1132_vm11, %v2059_v57 }
 0x442   : > { %1656 = vmatprep.mubr.f32.mxu0 %v2343_v37 }
 0x44a   : > { %v1358_v61 = vpop.permute.xlu0 %1357 }
 0x514   : > { %v1429_v1 = vpop.f32.mrb[6].mxu0 }
 0x515   : > { %v1430_v2 = vadd.f32 %v1429_v1, %v1358_v61  ;;  %v1431_v3 = vpop.f32.mrb[7].mxu0 }
 0x516   : > { %v1432_v4 = vadd.f32 %v1431_v3, %v1358_v61 }
 0x517   : > { %v1436_v5 = vmul.f32 0.70710677, %v1430_v2 }
 0x518   : > { %v1437_v8 = vmul.f32 0.70710677, %v1432_v4 }
 0x519   : > { %v1438_v9 = vand.u32 2147483647, %v1436_v5  ;;  %vm1478_vm14 = vcmp.lt.f32.partialorder %v1436_v5, 0.0 }
 0x51a   : > { %v1439_v10 = vand.u32 2147483647, %v1437_v8  ;;  %vm1479_vm15 = vcmp.lt.f32.partialorder %v1437_v8, 0.0 }
 0x51b   : > { %v1440_v12 = vmul.f32 0.3275911, %v1438_v9  ;;  %v1466_v20 = vsub.f32 0.0, %v1438_v9 }
 0x51c   : > { %v1441_v15 = vmul.f32 0.3275911, %v1439_v10  ;;  %v1467_v23 = vsub.f32 0.0, %v1439_v10 }
 0x51d   : > { %v1442_v16 = vadd.f32 1.0, %v1440_v12  ;;  %v1468_v28 = vmul.f32 %v1466_v20, %v1438_v9  ;;  %v1434_v9 = vmul.f32 0.5, %v1430_v2 }
 0x51e   : > { %v1443_v17 = vadd.f32 1.0, %v1441_v15  ;;  %v1469_v31 = vmul.f32 %v1467_v23, %v1439_v10 }
 0x51f   : > { %2276 = vrcp.f32 %v1442_v16  ;;  %v1470_v6 = vmul.f32 1.442695, %v1468_v28 }
 0x520   : > { %2278 = vrcp.f32 %v1443_v17  ;;  %v1472_v42 = vmul.f32 1.442695, %v1469_v31  ;;  %v1435_v17 = vmul.f32 0.5, %v1432_v4 }
 0x521   : > { %2280 = vpow2.f32 %v1470_v6 }
 0x522   : > { %2282 = vpow2.f32 %v1472_v42 }
 0x529   : > { %v2277_v24 = vpop.eup %2276 }
 0x52a   : > { %v2279_v30 = vpop.eup %2278  ;;  %v1448_v7 = vmul.f32 1.0614054, %v2277_v24 }
 0x52b   : > { %v1449_v32 = vmul.f32 1.0614054, %v2279_v30  ;;  %v2281_v52 = vpop.eup %2280 }
 0x52c   : > { %v1450_v33 = vadd.f32 -1.4531521, %v1448_v7  ;;  %v2283_v54 = vpop.eup %2282 }
 0x52d   : > { %v1451_v34 = vadd.f32 -1.4531521, %v1449_v32 }
 0x52e   : > { %v1452_v36 = vmul.f32 %v2277_v24, %v1450_v33 }
 0x52f   : > { %v1453_v43 = vmul.f32 %v2279_v30, %v1451_v34 }
 0x530   : > { %v1454_v44 = vadd.f32 1.4214138, %v1452_v36 }
 0x531   : > { %v1455_v46 = vadd.f32 1.4214138, %v1453_v43 }
 0x532   : > { %v1456_v47 = vmul.f32 %v2277_v24, %v1454_v44 }
 0x533   : > { %v1457_v35 = vmul.f32 %v2279_v30, %v1455_v46 }
 0x534   : > { %v1458_v38 = vadd.f32 -0.28449672, %v1456_v47 }
 0x535   : > { %v1459_v39 = vadd.f32 -0.28449672, %v1457_v35 }
 0x536   : > { %v1460_v41 = vmul.f32 %v2277_v24, %v1458_v38 }
 0x537   : > { %v1461_v48 = vmul.f32 %v2279_v30, %v1459_v39 }
 0x538   : > { %v1462_v49 = vadd.f32 0.2548296, %v1460_v41 }
 0x539   : > { %v1463_v50 = vadd.f32 0.2548296, %v1461_v48 }
 0x53a   : > { %v1464_v51 = vmul.f32 %v2277_v24, %v1462_v49 }
 0x53b   : > { %v1465_v53 = vmul.f32 %v2279_v30, %v1463_v50 }
 0x53c   : > { %v1474_v45 = vmul.f32 %v2281_v52, %v1464_v51 }
 0x53d   : > { %v1475_v55 = vmul.f32 %v2283_v54, %v1465_v53 }
 0x53e   : > { %v1476_v56 = vsub.f32 1.0, %v1474_v45 }
 0x53f   : > { %v1477_v57 = vsub.f32 1.0, %v1475_v55 }
 0x540   : > { %v1480_v61 = vsub.f32 0.0, %v1476_v56 }
 0x541   : > { %v1481_v1 = vsub.f32 0.0, %v1477_v57 }
 0x542   : > { %v1482_v3 = vsel %vm1478_vm14, %v1480_v61, %v1476_v56 }
 0x543   : > { %v1484_v10 = vadd.f32 1.0, %v1482_v3  ;;  %v1483_v12 = vsel %vm1479_vm15, %v1481_v1, %v1477_v57 }
 0x544   : > { %v1485_v15 = vadd.f32 1.0, %v1483_v12 }
 0x545   : > { %v1486_v16 = vmul.f32 %v1484_v10, %v1434_v9 }
 0x546   : > { %v1487_v23 = vmul.f32 %v1485_v15, %v1435_v17 }
 0x547   : > { %v2723_v20 = vadd.f32 %v1486_v16, %v2501_v60  ;;  %v2063_v60 = vld [vmem:[%s2870_s6 + $0x18] sm:$0xff] }
 0x548   : > { %v1489_v5 = vadd.f32 %v1487_v23, %v2511_v62 }
 0x549   : > { %1540 = vrot.lane.b32.xlu1 %v2723_v20, %s2348_s11  ;;  %1499 = vrot.lane.b32.xlu0 %v2723_v20, %s2346_s9 }
 0x54d   : > { %1495 = vrot.lane.b32.xlu1 %v1489_v5, %s2346_s9  ;;  %1510 = vrot.lane.b32.xlu0 %v2723_v20, %s2345_s30 }
 0x551   : > { %1507 = vrot.lane.b32.xlu1 %v1489_v5, %s2345_s30  ;;  %1521 = vrot.lane.b32.xlu0 %v2723_v20, %s2347_s10 }
 0x555   : > { %1518 = vrot.lane.b32.xlu1 %v1489_v5, %s2347_s10  ;;  %1532 = vrot.lane.b32.xlu0 %v2723_v20, %s2349_s12 }
 0x559   : > { %1529 = vrot.lane.b32.xlu1 %v1489_v5, %s2349_s12  ;;  %1542 = vrot.lane.b32.xlu0 %v1489_v5, %s2348_s11 }
 0x55d   : > { %1551 = vrot.lane.b32.xlu1 %v2723_v20, %s2350_s13  ;;  %1553 = vrot.lane.b32.xlu0 %v1489_v5, %s2350_s13 }
 0x561   : > { %1562 = vrot.lane.b32.xlu1 %v2723_v20, %s2351_s14  ;;  %1564 = vrot.lane.b32.xlu0 %v1489_v5, %s2351_s14 }
 0x565   : > { %1573 = vrot.lane.b32.xlu1 %v2723_v20, %s2352_s15  ;;  %1575 = vrot.lane.b32.xlu0 %v1489_v5, %s2352_s15 }
 0x569   : > { %1586 = vperm.xlu1 %2267, %v2063_v60  }
 0x5bb   : > { %v1541_v62 = vpop.permute.xlu1 %1540  ;;  %v1500_v2 = vpop.permute.xlu0 %1499 }
 0x5bf   : > { %v1496_v4 = vpop.permute.xlu1 %1495  ;;  %v1511_v8 = vpop.permute.xlu0 %1510 }
 0x5c0   : > { %v1501_v24 = vsel %vm933_vm5, %v1500_v2, %v1496_v4  ;;  %v1504_v28 = vsel %vm933_vm5, %v1496_v4, %v1500_v2 }
 0x5c1   : > { %v1505_v33 = vmul.f32 %v1504_v28, %v2567_v18  ;;  %v1506_v6 = vmul.f32 %v1501_v24, %v2570_v19 }
 0x5c3   : > { %v1508_v30 = vpop.permute.xlu1 %1507  ;;  %v1522_v7 = vpop.permute.xlu0 %1521 }
 0x5c4   : > { %v1512_v31 = vsel %vm957_vm3, %v1511_v8, %v1508_v30  ;;  %v1515_v32 = vsel %vm957_vm3, %v1508_v30, %v1511_v8 }
 0x5c5   : > { %v1516_v34 = vmul.f32 %v1515_v32, %v2554_v13  ;;  %v1517_v36 = vmul.f32 %v1512_v31, %v2557_v14  ;;  %v2062_v32 = vld [vmem:[%s2869_s5 + $0x10] sm:$0xff] }
 0x5c7   : > { %v2195_v42 = vpack.c.bf16 %v1516_v34, %v1505_v33  ;;  %v1519_v43 = vpop.permute.xlu1 %1518  ;;  %v1533_v44 = vpop.permute.xlu0 %1532  ;;  %v2193_v46 = vpack.c.bf16 %v1517_v36, %v1506_v6 }
 0x5c8   : > { %v1526_v47 = vsel %vm982_vm4, %v1519_v43, %v1522_v7  ;;  %v1523_v35 = vsel %vm982_vm4, %v1522_v7, %v1519_v43 }
 0x5c9   : > { %2194 = vmatprep.subr.bf16.mxu0 %v2193_v46  ;;  %v1527_v38 = vmul.f32 %v1526_v47, %v2574_v21  ;;  %v1528_v48 = vmul.f32 %v1523_v35, %v2577_v22 }
 0x5ca   : > { %2196 = vmatpush1.bf16.msra.mxu0 %v2195_v42 }
 0x5cb   : > { %v1530_v39 = vpop.permute.xlu1 %1529  ;;  %v1543_v41 = vpop.permute.xlu0 %1542 }
 0x5cc   : > { %v1534_v49 = vsel %vm1007_vm6, %v1533_v44, %v1530_v39  ;;  %v1537_v50 = vsel %vm1007_vm6, %v1530_v39, %v1533_v44  ;;  %v1548_v51 = vsel %vm1031_vm7, %v1543_v41, %v1541_v62  ;;  %v1544_v54 = vsel %vm1031_vm7, %v1541_v62, %v1543_v41 }
 0x5cd   : > { %v1538_v52 = vmul.f32 %v1537_v50, %v2580_v25  ;;  %v1539_v53 = vmul.f32 %v1534_v49, %v2583_v26  ;;  %v1550_v45 = vmul.f32 %v1548_v51, %v2586_v27  ;;  %v1549_v1 = vmul.f32 %v1544_v54, %v2598_v40 }
 0x5cf   : > { %v2199_v55 = vpack.c.bf16 %v1538_v52, %v1527_v38  ;;  %v1552_v56 = vpop.permute.xlu1 %1551  ;;  %v1554_v57 = vpop.permute.xlu0 %1553  ;;  %v2197_v61 = vpack.c.bf16 %v1539_v53, %v1528_v48  ;;  %v2201_v3 = vpack.c.bf16 %v1550_v45, %v1489_v5  ;;  %v2203_v16 = vpack.c.bf16 %v1549_v1, %v2723_v20 }
 0x5d0   : > { %v1555_v9 = vsel %vm1056_vm8, %v1552_v56, %v1554_v57  ;;  %v1559_v10 = vsel %vm1056_vm8, %v1554_v57, %v1552_v56 }
 0x5d1   : > { %2198 = vmatprep.subr.bf16.mxu0 %v2197_v61  ;;  %v1560_v60 = vmul.f32 %v1555_v9, %v2616_v58  ;;  %v1561_v62 = vmul.f32 %v1559_v10, %v2619_v59 }
 0x5d2   : > { %2200 = vmatpush1.bf16.msra.mxu0 %v2199_v55 }
 0x5d3   : > { %v1563_v12 = vpop.permute.xlu1 %1562  ;;  %2202 = vmatprep.subr.bf16.mxu0 %v2201_v3  ;;  %v1565_v15 = vpop.permute.xlu0 %1564 }
 0x5d4   : > { %v1566_v17 = vsel %vm1081_vm9, %v1563_v12, %v1565_v15  ;;  %v1570_v23 = vsel %vm1081_vm9, %v1565_v15, %v1563_v12 }
 0x5d5   : > { %v1571_v5 = vmul.f32 %v1566_v17, %v2623_v63  ;;  %v1572_v2 = vmul.f32 %v1570_v23, %v2626_v0 }
 0x5d6   : > { %2204 = vmatpush1.bf16.msra.mxu0 %v2203_v16 }
 0x5d7   : > { %v2207_v4 = vpack.c.bf16 %v1571_v5, %v1560_v60  ;;  %v1574_v8 = vpop.permute.xlu1 %1573  ;;  %v1576_v24 = vpop.permute.xlu0 %1575  ;;  %v2205_v28 = vpack.c.bf16 %v1572_v2, %v1561_v62 }
 0x5d8   : > { %v1581_v30 = vsel %vm1106_vm10, %v1576_v24, %v1574_v8  ;;  %v1577_v20 = vsel %vm1106_vm10, %v1574_v8, %v1576_v24 }
 0x5d9   : > { %v1583_v7 = vmul.f32 %v1581_v30, %v2637_v11  ;;  %2206 = vmatprep.subr.bf16.mxu0 %v2205_v28  ;;  %v1582_v31 = vmul.f32 %v1577_v20, %v2644_v29 }
 0x5da   : > { %2208 = vmatpush1.bf16.msra.mxu0 %v2207_v4 }
 0x5db   : > { %1608 = vmatprep.subr.mxu0 %v1583_v7 }
 0x5de   : > { %1609 = vmatpush1.msra.mxu0 %v1582_v31 }
 0x5df   : > { %2064 = vmatmul.mubr.msk.f32.vlgmr.msra.gmra.mrb[8].mxu0 %vm1132_vm11, %v2062_v32 }
 0x5e0   : > { %1883 = vmatprep.mubr.f32.mxu0 %v2343_v37 }
 0x5e8   : > { %v1587_v33 = vpop.permute.xlu1 %1586 }
 0x6b2   : > { %v1658_v6 = vpop.f32.mrb[8].mxu0 }
 0x6b3   : > { %v1659_v34 = vadd.f32 %v1658_v6, %v1587_v33  ;;  %v1660_v36 = vpop.f32.mrb[9].mxu0 }
 0x6b4   : > { %v1661_v42 = vadd.f32 %v1660_v36, %v1587_v33 }
 0x6b5   : > { %v1665_v43 = vmul.f32 0.70710677, %v1659_v34  ;;  %v1663_v33 = vmul.f32 0.5, %v1659_v34  ;;  %v2066_v34 = vld [vmem:[%s2870_s6 + $0x20] sm:$0xff] }
 0x6b6   : > { %v1666_v44 = vmul.f32 0.70710677, %v1661_v42 }
 0x6b7   : > { %v1667_v46 = vand.u32 2147483647, %v1665_v43  ;;  %vm1707_vm0 = vcmp.lt.f32.partialorder %v1665_v43, 0.0 }
 0x6b8   : > { %v1668_v47 = vand.u32 2147483647, %v1666_v44  ;;  %vm1708_vm1 = vcmp.lt.f32.partialorder %v1666_v44, 0.0 }
 0x6b9   : > { %v1669_v35 = vmul.f32 0.3275911, %v1667_v46  ;;  %v1695_v48 = vsub.f32 0.0, %v1667_v46 }
 0x6ba   : > { %v1670_v38 = vmul.f32 0.3275911, %v1668_v47  ;;  %v1696_v49 = vsub.f32 0.0, %v1668_v47 }
 0x6bb   : > { %v1671_v39 = vadd.f32 1.0, %v1669_v35  ;;  %v1697_v51 = vmul.f32 %v1695_v48, %v1667_v46  ;;  %v1664_v35 = vmul.f32 0.5, %v1661_v42 }
 0x6bc   : > { %v1672_v41 = vadd.f32 1.0, %v1670_v38  ;;  %v1698_v53 = vmul.f32 %v1696_v49, %v1668_v47 }
 0x6bd   : > { %2284 = vrcp.f32 %v1671_v39  ;;  %v1699_v55 = vmul.f32 1.442695, %v1697_v51 }
 0x6be   : > { %2286 = vrcp.f32 %v1672_v41  ;;  %v1701_v61 = vmul.f32 1.442695, %v1698_v53 }
 0x6bf   : > { %2288 = vpow2.f32 %v1699_v55 }
 0x6c0   : > { %2290 = vpow2.f32 %v1701_v61 }
 0x6c7   : > { %v2285_v50 = vpop.eup %2284 }
 0x6c8   : > { %v2287_v37 = vpop.eup %2286  ;;  %v1677_v52 = vmul.f32 1.0614054, %v2285_v50 }
 0x6c9   : > { %v1678_v54 = vmul.f32 1.0614054, %v2287_v37  ;;  %v2289_v2 = vpop.eup %2288 }
 0x6ca   : > { %v1679_v45 = vadd.f32 -1.4531521, %v1677_v52  ;;  %v2291_v8 = vpop.eup %2290 }
 0x6cb   : > { %v1680_v56 = vadd.f32 -1.4531521, %v1678_v54 }
 0x6cc   : > { %v1681_v57 = vmul.f32 %v2285_v50, %v1679_v45 }
 0x6cd   : > { %v1682_v1 = vmul.f32 %v2287_v37, %v1680_v56 }
 0x6ce   : > { %v1683_v3 = vadd.f32 1.4214138, %v1681_v57 }
 0x6cf   : > { %v1684_v9 = vadd.f32 1.4214138, %v1682_v1 }
 0x6d0   : > { %v1685_v10 = vmul.f32 %v2285_v50, %v1683_v3 }
 0x6d1   : > { %v1686_v12 = vmul.f32 %v2287_v37, %v1684_v9 }
 0x6d2   : > { %v1687_v15 = vadd.f32 -0.28449672, %v1685_v10 }
 0x6d3   : > { %v1688_v16 = vadd.f32 -0.28449672, %v1686_v12 }
 0x6d4   : > { %v1689_v17 = vmul.f32 %v2285_v50, %v1687_v15 }
 0x6d5   : > { %v1690_v23 = vmul.f32 %v2287_v37, %v1688_v16 }
 0x6d6   : > { %v1691_v60 = vadd.f32 0.2548296, %v1689_v17 }
 0x6d7   : > { %v1692_v62 = vadd.f32 0.2548296, %v1690_v23 }
 0x6d8   : > { %v1693_v5 = vmul.f32 %v2285_v50, %v1691_v60 }
 0x6d9   : > { %v1694_v4 = vmul.f32 %v2287_v37, %v1692_v62 }
 0x6da   : > { %v1703_v24 = vmul.f32 %v2289_v2, %v1693_v5 }
 0x6db   : > { %v1704_v28 = vmul.f32 %v2291_v8, %v1694_v4 }
 0x6dc   : > { %v1705_v30 = vsub.f32 1.0, %v1703_v24 }
 0x6dd   : > { %v1706_v20 = vsub.f32 1.0, %v1704_v28 }
 0x6de   : > { %v1709_v7 = vsub.f32 0.0, %v1705_v30 }
 0x6df   : > { %v1710_v31 = vsub.f32 0.0, %v1706_v20 }
 0x6e0   : > { %v1711_v32 = vsel %vm1707_vm0, %v1709_v7, %v1705_v30 }
 0x6e1   : > { %v1713_v6 = vadd.f32 1.0, %v1711_v32  ;;  %v1712_v36 = vsel %vm1708_vm1, %v1710_v31, %v1706_v20 }
 0x6e2   : > { %v1714_v47 = vadd.f32 1.0, %v1712_v36 }
 0x6e3   : > { %v2791_v46 = vmul.f32 %v1713_v6, %v1663_v33 }
 0x6e4   : > { %v1716_v38 = vmul.f32 %v1714_v47, %v1664_v35 }
 0x6e5   : > { %1767 = vrot.lane.b32.xlu0 %v2791_v46, %s2348_s11  ;;  %1726 = vrot.lane.b32.xlu1 %v2791_v46, %s2346_s9 }
 0x6e9   : > { %1722 = vrot.lane.b32.xlu0 %v1716_v38, %s2346_s9  ;;  %1737 = vrot.lane.b32.xlu1 %v2791_v46, %s2345_s30 }
 0x6ed   : > { %1734 = vrot.lane.b32.xlu0 %v1716_v38, %s2345_s30  ;;  %1748 = vrot.lane.b32.xlu1 %v2791_v46, %s2347_s10 }
 0x6f1   : > { %1745 = vrot.lane.b32.xlu0 %v1716_v38, %s2347_s10  ;;  %1759 = vrot.lane.b32.xlu1 %v2791_v46, %s2349_s12 }
 0x6f5   : > { %1756 = vrot.lane.b32.xlu0 %v1716_v38, %s2349_s12  ;;  %1769 = vrot.lane.b32.xlu1 %v1716_v38, %s2348_s11  ;;  %s2070_s12 = sshll.u32 %s2881_s28, 4 }
 0x6f9   : > { %1778 = vrot.lane.b32.xlu0 %v2791_v46, %s2350_s13  ;;  %1780 = vrot.lane.b32.xlu1 %v1716_v38, %s2350_s13 }
 0x6fd   : > { %1789 = vrot.lane.b32.xlu0 %v2791_v46, %s2351_s14  ;;  %1791 = vrot.lane.b32.xlu1 %v1716_v38, %s2351_s14 }
 0x701   : > { %1800 = vrot.lane.b32.xlu0 %v2791_v46, %s2352_s15  ;;  %1802 = vrot.lane.b32.xlu1 %v1716_v38, %s2352_s15  ;;  %s334_s15 = scalar_lea.vmem %s2872_s8, %s2070_s12 }
 0x705   : > { %1813 = vperm.xlu0 %2266, %v2066_v34  }
 0x757   : > { %v1768_v42 = vpop.permute.xlu0 %1767  ;;  %v1727_v43 = vpop.permute.xlu1 %1726 }
 0x75b   : > { %v1723_v44 = vpop.permute.xlu0 %1722  ;;  %v1738_v39 = vpop.permute.xlu1 %1737 }
 0x75c   : > { %v1728_v41 = vsel %vm933_vm5, %v1727_v43, %v1723_v44  ;;  %v1731_v48 = vsel %vm933_vm5, %v1723_v44, %v1727_v43 }
 0x75d   : > { %v1732_v52 = vmul.f32 %v1731_v48, %v2567_v18  ;;  %v1733_v53 = vmul.f32 %v1728_v41, %v2570_v19 }
 0x75f   : > { %v1735_v49 = vpop.permute.xlu0 %1734  ;;  %v1749_v50 = vpop.permute.xlu1 %1748 }
 0x760   : > { %v1739_v51 = vsel %vm957_vm3, %v1738_v39, %v1735_v49  ;;  %v1742_v37 = vsel %vm957_vm3, %v1735_v49, %v1738_v39 }
 0x761   : > { %v1743_v54 = vmul.f32 %v1742_v37, %v2554_v13  ;;  %v1744_v45 = vmul.f32 %v1739_v51, %v2557_v14 }
 0x763   : > { %v2211_v55 = vpack.c.bf16 %v1743_v54, %v1732_v52  ;;  %v1746_v56 = vpop.permute.xlu0 %1745  ;;  %v1760_v57 = vpop.permute.xlu1 %1759  ;;  %v2209_v61 = vpack.c.bf16 %v1744_v45, %v1733_v53 }
 0x764   : > { %v1753_v1 = vsel %vm982_vm4, %v1746_v56, %v1749_v50  ;;  %v1750_v3 = vsel %vm982_vm4, %v1749_v50, %v1746_v56 }
 0x765   : > { %2210 = vmatprep.subr.bf16.mxu0 %v2209_v61  ;;  %v1754_v9 = vmul.f32 %v1753_v1, %v2574_v21  ;;  %v1755_v19 = vmul.f32 %v1750_v3, %v2577_v22 }
 0x766   : > { %2212 = vmatpush1.bf16.msra.mxu0 %v2211_v55 }
 0x767   : > { %v1757_v10 = vpop.permute.xlu0 %1756  ;;  %v1770_v18 = vpop.permute.xlu1 %1769 }
 0x768   : > { %v1761_v13 = vsel %vm1007_vm6, %v1760_v57, %v1757_v10  ;;  %v1764_v14 = vsel %vm1007_vm6, %v1757_v10, %v1760_v57  ;;  %v1775_v12 = vsel %vm1031_vm7, %v1770_v18, %v1768_v42  ;;  %v1771_v17 = vsel %vm1031_vm7, %v1768_v42, %v1770_v18 }
 0x769   : > { %v1765_v15 = vmul.f32 %v1764_v14, %v2580_v25  ;;  %v1766_v16 = vmul.f32 %v1761_v13, %v2583_v26  ;;  %v1777_v23 = vmul.f32 %v1775_v12, %v2586_v27  ;;  %v1776_v22 = vmul.f32 %v1771_v17, %v2598_v40 }
 0x76b   : > { %v2215_v60 = vpack.c.bf16 %v1765_v15, %v1754_v9  ;;  %v1779_v21 = vpop.permute.xlu0 %1778  ;;  %v1781_v62 = vpop.permute.xlu1 %1780  ;;  %v2213_v5 = vpack.c.bf16 %v1766_v16, %v1755_v19  ;;  %v2217_v2 = vpack.c.bf16 %v1777_v23, %v1716_v38  ;;  %v2219_v24 = vpack.c.bf16 %v1776_v22, %v2791_v46 }
 0x76c   : > { %v1782_v4 = vsel %vm1056_vm8, %v1779_v21, %v1781_v62  ;;  %v1786_v8 = vsel %vm1056_vm8, %v1781_v62, %v1779_v21 }
 0x76d   : > { %2214 = vmatprep.subr.bf16.mxu0 %v2213_v5  ;;  %v1787_v30 = vmul.f32 %v1782_v4, %v2616_v58  ;;  %v1788_v40 = vmul.f32 %v1786_v8, %v2619_v59  ;;  %v2065_v59 = vld [vmem:[%s2869_s5 + $0x18] sm:$0xff] }
 0x76e   : > { %2216 = vmatpush1.bf16.msra.mxu0 %v2215_v60 }
 0x76f   : > { %v1790_v25 = vpop.permute.xlu0 %1789  ;;  %2218 = vmatprep.subr.bf16.mxu0 %v2217_v2  ;;  %v1792_v26 = vpop.permute.xlu1 %1791 }
 0x770   : > { %v1793_v27 = vsel %vm1081_vm9, %v1790_v25, %v1792_v26  ;;  %v1797_v28 = vsel %vm1081_vm9, %v1792_v26, %v1790_v25 }
 0x771   : > { %v1798_v20 = vmul.f32 %v1793_v27, %v2623_v63  ;;  %v1799_v7 = vmul.f32 %v1797_v28, %v2626_v0 }
 0x772   : > { %2220 = vmatpush1.bf16.msra.mxu0 %v2219_v24 }
 0x773   : > { %v2223_v31 = vpack.c.bf16 %v1798_v20, %v1787_v30  ;;  %v1801_v32 = vpop.permute.xlu0 %1800  ;;  %v1803_v33 = vpop.permute.xlu1 %1802  ;;  %v2221_v6 = vpack.c.bf16 %v1799_v7, %v1788_v40 }
 0x774   : > { %v1808_v36 = vsel %vm1106_vm10, %v1803_v33, %v1801_v32  ;;  %v1804_v46 = vsel %vm1106_vm10, %v1801_v32, %v1803_v33 }
 0x775   : > { %v1810_v47 = vmul.f32 %v1808_v36, %v2637_v11  ;;  %2222 = vmatprep.subr.bf16.mxu0 %v2221_v6  ;;  %v1809_v58 = vmul.f32 %v1804_v46, %v2644_v29 }
 0x776   : > { %2224 = vmatpush1.bf16.msra.mxu0 %v2223_v31 }
 0x777   : > { %1835 = vmatprep.subr.mxu0 %v1810_v47 }
 0x77a   : > { %1836 = vmatpush1.msra.mxu0 %v1809_v58 }
 0x77b   : > { %2067 = vmatmul.mubr.msk.f32.vlgmr.msra.gmra.mrb[10].mxu0 %vm1132_vm11, %v2065_v59 }
 0x784   : > { %v1814_v63 = vpop.permute.xlu0 %1813 }
 0x84e   : > { %v1885_v0 = vpop.f32.mrb[10].mxu0 }
 0x84f   : > { %v1886_v35 = vadd.f32 %v1885_v0, %v1814_v63  ;;  %v1887_v38 = vpop.f32.mrb[11].mxu0 }
 0x850   : > { %v1888_v34 = vadd.f32 %v1887_v38, %v1814_v63 }
 0x851   : > { %v1892_v42 = vmul.f32 0.70710677, %v1886_v35  ;;  %v1890_v24 = vmul.f32 0.5, %v1886_v35 }
 0x852   : > { %v1893_v43 = vmul.f32 0.70710677, %v1888_v34  ;;  %v1891_v30 = vmul.f32 0.5, %v1888_v34 }
 0x853   : > { %v1894_v11 = vand.u32 2147483647, %v1892_v42  ;;  %vm1934_vm2 = vcmp.lt.f32.partialorder %v1892_v42, 0.0 }
 0x854   : > { %v1895_v44 = vand.u32 2147483647, %v1893_v43  ;;  %vm1935_vm3 = vcmp.lt.f32.partialorder %v1893_v43, 0.0 }
 0x855   : > { %v1896_v39 = vmul.f32 0.3275911, %v1894_v11  ;;  %v1922_v49 = vsub.f32 0.0, %v1894_v11 }
 0x856   : > { %v1897_v41 = vmul.f32 0.3275911, %v1895_v44  ;;  %v1923_v50 = vsub.f32 0.0, %v1895_v44 }
 0x857   : > { %v1898_v48 = vadd.f32 1.0, %v1896_v39  ;;  %v1924_v37 = vmul.f32 %v1922_v49, %v1894_v11 }
 0x858   : > { %v1899_v29 = vadd.f32 1.0, %v1897_v41  ;;  %v1925_v54 = vmul.f32 %v1923_v50, %v1895_v44 }
 0x859   : > { %2292 = vrcp.f32 %v1898_v48  ;;  %v1926_v56 = vmul.f32 1.442695, %v1924_v37 }
 0x85a   : > { %2294 = vrcp.f32 %v1899_v29  ;;  %v1928_v1 = vmul.f32 1.442695, %v1925_v54 }
 0x85b   : > { %2296 = vpow2.f32 %v1926_v56 }
 0x85c   : > { %2298 = vpow2.f32 %v1928_v1 }
 0x863   : > { %v2293_v51 = vpop.eup %2292 }
 0x864   : > { %v2295_v52 = vpop.eup %2294  ;;  %v1904_v53 = vmul.f32 1.0614054, %v2293_v51 }
 0x865   : > { %v1905_v45 = vmul.f32 1.0614054, %v2295_v52  ;;  %v2297_v60 = vpop.eup %2296 }
 0x866   : > { %v1906_v55 = vadd.f32 -1.4531521, %v1904_v53  ;;  %v2299_v62 = vpop.eup %2298 }
 0x867   : > { %v1907_v57 = vadd.f32 -1.4531521, %v1905_v45 }
 0x868   : > { %v1908_v61 = vmul.f32 %v2293_v51, %v1906_v55 }
 0x869   : > { %v1909_v3 = vmul.f32 %v2295_v52, %v1907_v57 }
 0x86a   : > { %v1910_v9 = vadd.f32 1.4214138, %v1908_v61 }
 0x86b   : > { %v1911_v10 = vadd.f32 1.4214138, %v1909_v3 }
 0x86c   : > { %v1912_v18 = vmul.f32 %v2293_v51, %v1910_v9 }
 0x86d   : > { %v1913_v19 = vmul.f32 %v2295_v52, %v1911_v10 }
 0x86e   : > { %v1914_v13 = vadd.f32 -0.28449672, %v1912_v18 }
 0x86f   : > { %v1915_v14 = vadd.f32 -0.28449672, %v1913_v19 }
 0x870   : > { %v1916_v12 = vmul.f32 %v2293_v51, %v1914_v13 }
 0x871   : > { %v1917_v15 = vmul.f32 %v2295_v52, %v1915_v14 }
 0x872   : > { %v1918_v16 = vadd.f32 0.2548296, %v1916_v12 }
 0x873   : > { %v1919_v17 = vadd.f32 0.2548296, %v1917_v15 }
 0x874   : > { %v1920_v23 = vmul.f32 %v2293_v51, %v1918_v16 }
 0x875   : > { %v1921_v21 = vmul.f32 %v2295_v52, %v1919_v17 }
 0x876   : > { %v1930_v5 = vmul.f32 %v2297_v60, %v1920_v23 }
 0x877   : > { %v1931_v22 = vmul.f32 %v2299_v62, %v1921_v21 }
 0x878   : > { %v1932_v2 = vsub.f32 1.0, %v1930_v5 }
 0x879   : > { %v1933_v4 = vsub.f32 1.0, %v1931_v22 }
 0x87a   : > { %v1936_v8 = vsub.f32 0.0, %v1932_v2 }
 0x87b   : > { %v1937_v25 = vsub.f32 0.0, %v1933_v4 }
 0x87c   : > { %v1938_v26 = vsel %vm1934_vm2, %v1936_v8, %v1932_v2 }
 0x87d   : > { %v1940_v27 = vadd.f32 1.0, %v1938_v26  ;;  %v1939_v28 = vsel %vm1935_vm3, %v1937_v25, %v1933_v4 }
 0x87e   : > { %v1941_v40 = vadd.f32 1.0, %v1939_v28 }
 0x87f   : > { %v1942_v20 = vmul.f32 %v1940_v27, %v1890_v24 }
 0x880   : > { %v1943_v7 = vmul.f32 %v1941_v40, %v1891_v30 }
 0x881   : > { %1944 = vst [vmem:[%s334_s15] sm:$0xff] %v1942_v20 }
 0x882   : > { %1945 = vst [vmem:[%s334_s15 + $0x8] sm:$0xff] %v1943_v7 }
 0x883 PF: > { %s19_s27 = sadd.s32 1, %s2338_s27  }
 0x884   : > { %p16_p3 = scmp.ge.s32.totalorder %s19_s27, 4  }
 0x886   :  { %18 = sbr.rel (!%p16_p3) target bundleno = 1 (0x1), region = 107 }
 0x88d   :  { %1967 = vsyncpa [#allocation3], 1 }
 0x88e   :  { %1969 = vsyncpa [#allocation3 + $0x1], 1 }

</bundles_post_ra>
